<compile_context>
chip_gen: v7x
topology: tpu7x:2x2x1
jax: 0.10.0
libtpu: 0.0.40
codegen_flags: <defaults>
</compile_context>

<pallas_src>
import functools
import math

import jax
import jax.numpy as jnp
from jax import lax
from jax.experimental import pallas as pl
from jax.experimental.pallas import tpu as pltpu


def _conv_kernel(x_ref, w_ref, b_ref, o_ref, xpad_ref, *,
                 K, stride, pad, H, W, HO, WO, CIN, COUT):
    # x_ref:    (1, CIN, H, W)     unpadded input for one batch element
    # w_ref:    (K*K, COUT, CIN)   per-tap weights
    # b_ref:    (COUT, 1)          bias
    # o_ref:    (1, COUT, HO*WO)   flattened-spatial output (lane-dense)
    # xpad_ref: (CIN, Hp, Wp)      VMEM scratch: zero-padded copy of the input
    Hp = H + 2 * pad
    Wp = W + 2 * pad

    # Fold zero-padding into the kernel: zero the scratch, then drop the
    # unpadded tile into its interior.  VMEM traffic only; no padded copy
    # of the activation tensor ever hits HBM.
    xpad_ref[...] = jnp.zeros((CIN, Hp, Wp), dtype=xpad_ref.dtype)
    xpad_ref[:, pad:pad + H, pad:pad + W] = x_ref[0]

    span_h = (HO - 1) * stride + 1
    span_w = (WO - 1) * stride + 1

    # Accumulator (COUT, HO*WO): spatial on lanes, initialized with the bias.
    acc = jnp.broadcast_to(b_ref[...].astype(jnp.float32), (COUT, HO * WO))

    for kh in range(K):
        for kw in range(K):
            if stride == 1:
                # Direct ref slice of this tap's window: (CIN, HO, WO).
                patch = xpad_ref[:, kh:kh + span_h, kw:kw + span_w]
            else:
                # Generic strided case (not exercised by the toy test):
                # load the contiguous window, then stride-slice the value.
                win = xpad_ref[:, kh:kh + span_h, kw:kw + span_w]
                patch = win[:, ::stride, ::stride]
            acc = acc + jnp.dot(
                w_ref[kh * K + kw],                 # (COUT, CIN)
                patch.reshape(CIN, HO * WO),        # (CIN, HO*WO)
                preferred_element_type=jnp.float32,
            )

    o_ref[0] = acc.astype(o_ref.dtype)


def conv_layer_pallas(x_nchw, weight_oihw, bias, *, stride):
    """Zero-padded Conv2d matching nn.Conv2d(..., padding=floor(k/2))."""
    N, CIN, H, W = x_nchw.shape
    COUT, CIN_w, K, K2 = weight_oihw.shape
    assert CIN == CIN_w and K == K2
    pad = int(math.floor(K / 2))
    HO = (H + 2 * pad - K) // stride + 1
    WO = (W + 2 * pad - K) // stride + 1
    Hp, Wp = H + 2 * pad, W + 2 * pad

    # Only tiny parameter reshapes happen outside the kernel (no activation
    # transposes, no padded activation copy).
    w_taps = jnp.transpose(weight_oihw, (2, 3, 0, 1)).reshape(K * K, COUT, CIN)
    b2 = bias.reshape(COUT, 1)

    kernel = functools.partial(
        _conv_kernel, K=K, stride=stride, pad=pad,
        H=H, W=W, HO=HO, WO=WO, CIN=CIN, COUT=COUT,
    )

    out_flat = pl.pallas_call(
        kernel,
        out_shape=jax.ShapeDtypeStruct((N, COUT, HO * WO), x_nchw.dtype),
        grid_spec=pltpu.PrefetchScalarGridSpec(
            num_scalar_prefetch=0,
            grid=(N,),
            in_specs=[
                pl.BlockSpec((1, CIN, H, W), lambda n: (n, 0, 0, 0)),
                pl.BlockSpec((K * K, COUT, CIN), lambda n: (0, 0, 0)),
                pl.BlockSpec((COUT, 1), lambda n: (0, 0)),
            ],
            out_specs=pl.BlockSpec((1, COUT, HO * WO), lambda n: (n, 0, 0)),
            scratch_shapes=[pltpu.VMEM((CIN, Hp, Wp), x_nchw.dtype)],
        ),
        compiler_params=pltpu.CompilerParams(
            # Batch axis is embarrassingly parallel (megacore sharding on v7x).
            dimension_semantics=("parallel",),
        ),
    )(x_nchw, w_taps, b2)

    # Splitting the trailing contiguous dim is free (no HBM pass).
    return out_flat.reshape(N, COUT, HO, WO)


if __name__ == "__main__":
    # Small shapes consistent with the module: ConvLayer(4, 8, kernel_size=3, stride=1)
    N, CIN, H, W = 2, 4, 16, 16
    COUT, K, STRIDE = 8, 3, 1

    key = jax.random.PRNGKey(0)
    kx, kw, kb = jax.random.split(key, 3)
    x = jax.random.normal(kx, (N, CIN, H, W), dtype=jnp.float32)
    # Deterministic parameter init (synthetic, kaiming-uniform-like bound).
    bound = 1.0 / math.sqrt(CIN * K * K)
    weight = jax.random.uniform(kw, (COUT, CIN, K, K), jnp.float32, -bound, bound)
    bias = jax.random.uniform(kb, (COUT,), jnp.float32, -bound, bound)

    out = conv_layer_pallas(x, weight, bias, stride=STRIDE)
    out = jax.block_until_ready(out)

    # Cross-check against XLA's conv (same semantics as nn.Conv2d with zero pad).
    ref = lax.conv_general_dilated(
        x, weight,
        window_strides=(STRIDE, STRIDE),
        padding=[(K // 2, K // 2), (K // 2, K // 2)],
        dimension_numbers=("NCHW", "OIHW", "NCHW"),
    ) + bias.reshape(1, COUT, 1, 1)
    assert out.shape == (N, COUT, H, W)
    assert jnp.allclose(out, ref, atol=1e-4, rtol=1e-4)

    print("KERNEL_OK")
</pallas_src>

<mosaic_0001>
module attributes {stable_mosaic.version = 11 : i64} {
  func.func @_conv_kernel(%arg0: i32, %arg1: memref<1x4x16x16xf32, #tpu.memory_space<vmem>>, %arg2: memref<9x8x4xf32, #tpu.memory_space<vmem>>, %arg3: memref<8x1xf32, #tpu.memory_space<vmem>>, %arg4: memref<1x8x256xf32, #tpu.memory_space<vmem>>, %arg5: memref<4x18x18xf32, #tpu.memory_space<vmem>>) attributes {dimension_semantics = [#tpu.dimension_semantics<parallel>], iteration_bounds = array<i64: 2>, scalar_prefetch = 0 : i64, scratch_operands = 1 : i64, tpu.core_type = #tpu.core_type<tc>, window_params = [{transform_indices = @transform_0, window_bounds = array<i64: 1, 4, 16, 16>}, {pipeline_mode = #tpu.pipeline_mode<synchronous>, transform_indices = @transform_1, window_bounds = array<i64: 9, 8, 4>}, {pipeline_mode = #tpu.pipeline_mode<synchronous>, transform_indices = @transform_2, window_bounds = array<i64: 8, 1>}, {transform_indices = @transform_3, window_bounds = array<i64: 1, 8, 256>}]} {
    %cst = arith.constant 0.000000e+00 : f32
    %0 = vector.broadcast %cst : f32 to vector<4x18x18xf32>
    %c0 = arith.constant 0 : index
    %c0_0 = arith.constant 0 : index
    %c0_1 = arith.constant 0 : index
    %1 = vector.load %arg5[%c0, %c0_0, %c0_1] : memref<4x18x18xf32, #tpu.memory_space<vmem>>, vector<4x18x18xf32>
    tpu.vector_store %arg5[%c0, %c0_0, %c0_1], %0 {strides = array<i32>} : memref<4x18x18xf32, #tpu.memory_space<vmem>>, vector<4x18x18xf32>,
    %c0_2 = arith.constant 0 : index
    %c0_3 = arith.constant 0 : index
    %c0_4 = arith.constant 0 : index
    %c0_5 = arith.constant 0 : index
    %2 = vector.load %arg1[%c0_2, %c0_3, %c0_4, %c0_5] : memref<1x4x16x16xf32, #tpu.memory_space<vmem>>, vector<1x4x16x16xf32>
    %3 = vector.shape_cast %2 : vector<1x4x16x16xf32> to vector<4x16x16xf32>
    %c0_6 = arith.constant 0 : index
    %c1 = arith.constant 1 : index
    %c1_7 = arith.constant 1 : index
    %4 = vector.load %arg5[%c0_6, %c1, %c1_7] : memref<4x18x18xf32, #tpu.memory_space<vmem>>, vector<4x16x16xf32>
    tpu.vector_store %arg5[%c0_6, %c1, %c1_7], %3 {strides = array<i32>} : memref<4x18x18xf32, #tpu.memory_space<vmem>>, vector<4x16x16xf32>,
    %c0_8 = arith.constant 0 : index
    %c0_9 = arith.constant 0 : index
    %5 = vector.load %arg3[%c0_8, %c0_9] : memref<8x1xf32, #tpu.memory_space<vmem>>, vector<8x1xf32>
    %6 = vector.shape_cast %5 : vector<8x1xf32> to vector<8x1xf32>
    %7 = vector.broadcast %6 : vector<8x1xf32> to vector<8x256xf32>
    %c0_10 = arith.constant 0 : index
    %c0_11 = arith.constant 0 : index
    %c0_12 = arith.constant 0 : index
    %8 = vector.load %arg5[%c0_10, %c0_11, %c0_12] : memref<4x18x18xf32, #tpu.memory_space<vmem>>, vector<4x16x16xf32>
    %c0_13 = arith.constant 0 : index
    %c0_14 = arith.constant 0 : index
    %c0_15 = arith.constant 0 : index
    %9 = vector.load %arg2[%c0_13, %c0_14, %c0_15] : memref<9x8x4xf32, #tpu.memory_space<vmem>>, vector<1x8x4xf32>
    %10 = vector.shape_cast %9 : vector<1x8x4xf32> to vector<8x4xf32>
    %11 = vector.shape_cast %8 : vector<4x16x16xf32> to vector<4x256xf32>
    %cst_16 = arith.constant dense<0.000000e+00> : vector<8x256xf32>
    %12 = tpu.matmul %10, %11, %cst_16 {dimension_numbers = #tpu.dot_dimension_numbers<[1], [0], [0], [1], [0, 0, 1, 1], [], []>} : vector<8x4xf32>, vector<4x256xf32>, vector<8x256xf32> -> vector<8x256xf32>
    %13 = arith.addf %7, %12 : vector<8x256xf32>
    %c0_17 = arith.constant 0 : index
    %c0_18 = arith.constant 0 : index
    %c1_19 = arith.constant 1 : index
    %14 = vector.load %arg5[%c0_17, %c0_18, %c1_19] : memref<4x18x18xf32, #tpu.memory_space<vmem>>, vector<4x16x16xf32>
    %c1_20 = arith.constant 1 : index
    %c0_21 = arith.constant 0 : index
    %c0_22 = arith.constant 0 : index
    %15 = vector.load %arg2[%c1_20, %c0_21, %c0_22] : memref<9x8x4xf32, #tpu.memory_space<vmem>>, vector<1x8x4xf32>
    %16 = vector.shape_cast %15 : vector<1x8x4xf32> to vector<8x4xf32>
    %17 = vector.shape_cast %14 : vector<4x16x16xf32> to vector<4x256xf32>
    %cst_23 = arith.constant dense<0.000000e+00> : vector<8x256xf32>
    %18 = tpu.matmul %16, %17, %cst_23 {dimension_numbers = #tpu.dot_dimension_numbers<[1], [0], [0], [1], [0, 0, 1, 1], [], []>} : vector<8x4xf32>, vector<4x256xf32>, vector<8x256xf32> -> vector<8x256xf32>
    %19 = arith.addf %13, %18 : vector<8x256xf32>
    %c0_24 = arith.constant 0 : index
    %c0_25 = arith.constant 0 : index
    %c2 = arith.constant 2 : index
    %20 = vector.load %arg5[%c0_24, %c0_25, %c2] : memref<4x18x18xf32, #tpu.memory_space<vmem>>, vector<4x16x16xf32>
    %c2_26 = arith.constant 2 : index
    %c0_27 = arith.constant 0 : index
    %c0_28 = arith.constant 0 : index
    %21 = vector.load %arg2[%c2_26, %c0_27, %c0_28] : memref<9x8x4xf32, #tpu.memory_space<vmem>>, vector<1x8x4xf32>
    %22 = vector.shape_cast %21 : vector<1x8x4xf32> to vector<8x4xf32>
    %23 = vector.shape_cast %20 : vector<4x16x16xf32> to vector<4x256xf32>
    %cst_29 = arith.constant dense<0.000000e+00> : vector<8x256xf32>
    %24 = tpu.matmul %22, %23, %cst_29 {dimension_numbers = #tpu.dot_dimension_numbers<[1], [0], [0], [1], [0, 0, 1, 1], [], []>} : vector<8x4xf32>, vector<4x256xf32>, vector<8x256xf32> -> vector<8x256xf32>
    %25 = arith.addf %19, %24 : vector<8x256xf32>
    %c0_30 = arith.constant 0 : index
    %c1_31 = arith.constant 1 : index
    %c0_32 = arith.constant 0 : index
    %26 = vector.load %arg5[%c0_30, %c1_31, %c0_32] : memref<4x18x18xf32, #tpu.memory_space<vmem>>, vector<4x16x16xf32>
    %c3 = arith.constant 3 : index
    %c0_33 = arith.constant 0 : index
    %c0_34 = arith.constant 0 : index
    %27 = vector.load %arg2[%c3, %c0_33, %c0_34] : memref<9x8x4xf32, #tpu.memory_space<vmem>>, vector<1x8x4xf32>
    %28 = vector.shape_cast %27 : vector<1x8x4xf32> to vector<8x4xf32>
    %29 = vector.shape_cast %26 : vector<4x16x16xf32> to vector<4x256xf32>
    %cst_35 = arith.constant dense<0.000000e+00> : vector<8x256xf32>
    %30 = tpu.matmul %28, %29, %cst_35 {dimension_numbers = #tpu.dot_dimension_numbers<[1], [0], [0], [1], [0, 0, 1, 1], [], []>} : vector<8x4xf32>, vector<4x256xf32>, vector<8x256xf32> -> vector<8x256xf32>
    %31 = arith.addf %25, %30 : vector<8x256xf32>
    %c0_36 = arith.constant 0 : index
    %c1_37 = arith.constant 1 : index
    %c1_38 = arith.constant 1 : index
    %32 = vector.load %arg5[%c0_36, %c1_37, %c1_38] : memref<4x18x18xf32, #tpu.memory_space<vmem>>, vector<4x16x16xf32>
    %c4 = arith.constant 4 : index
    %c0_39 = arith.constant 0 : index
    %c0_40 = arith.constant 0 : index
    %33 = vector.load %arg2[%c4, %c0_39, %c0_40] : memref<9x8x4xf32, #tpu.memory_space<vmem>>, vector<1x8x4xf32>
    %34 = vector.shape_cast %33 : vector<1x8x4xf32> to vector<8x4xf32>
    %35 = vector.shape_cast %32 : vector<4x16x16xf32> to vector<4x256xf32>
    %cst_41 = arith.constant dense<0.000000e+00> : vector<8x256xf32>
    %36 = tpu.matmul %34, %35, %cst_41 {dimension_numbers = #tpu.dot_dimension_numbers<[1], [0], [0], [1], [0, 0, 1, 1], [], []>} : vector<8x4xf32>, vector<4x256xf32>, vector<8x256xf32> -> vector<8x256xf32>
    %37 = arith.addf %31, %36 : vector<8x256xf32>
    %c0_42 = arith.constant 0 : index
    %c1_43 = arith.constant 1 : index
    %c2_44 = arith.constant 2 : index
    %38 = vector.load %arg5[%c0_42, %c1_43, %c2_44] : memref<4x18x18xf32, #tpu.memory_space<vmem>>, vector<4x16x16xf32>
    %c5 = arith.constant 5 : index
    %c0_45 = arith.constant 0 : index
    %c0_46 = arith.constant 0 : index
    %39 = vector.load %arg2[%c5, %c0_45, %c0_46] : memref<9x8x4xf32, #tpu.memory_space<vmem>>, vector<1x8x4xf32>
    %40 = vector.shape_cast %39 : vector<1x8x4xf32> to vector<8x4xf32>
    %41 = vector.shape_cast %38 : vector<4x16x16xf32> to vector<4x256xf32>
    %cst_47 = arith.constant dense<0.000000e+00> : vector<8x256xf32>
    %42 = tpu.matmul %40, %41, %cst_47 {dimension_numbers = #tpu.dot_dimension_numbers<[1], [0], [0], [1], [0, 0, 1, 1], [], []>} : vector<8x4xf32>, vector<4x256xf32>, vector<8x256xf32> -> vector<8x256xf32>
    %43 = arith.addf %37, %42 : vector<8x256xf32>
    %c0_48 = arith.constant 0 : index
    %c2_49 = arith.constant 2 : index
    %c0_50 = arith.constant 0 : index
    %44 = vector.load %arg5[%c0_48, %c2_49, %c0_50] : memref<4x18x18xf32, #tpu.memory_space<vmem>>, vector<4x16x16xf32>
    %c6 = arith.constant 6 : index
    %c0_51 = arith.constant 0 : index
    %c0_52 = arith.constant 0 : index
    %45 = vector.load %arg2[%c6, %c0_51, %c0_52] : memref<9x8x4xf32, #tpu.memory_space<vmem>>, vector<1x8x4xf32>
    %46 = vector.shape_cast %45 : vector<1x8x4xf32> to vector<8x4xf32>
    %47 = vector.shape_cast %44 : vector<4x16x16xf32> to vector<4x256xf32>
    %cst_53 = arith.constant dense<0.000000e+00> : vector<8x256xf32>
    %48 = tpu.matmul %46, %47, %cst_53 {dimension_numbers = #tpu.dot_dimension_numbers<[1], [0], [0], [1], [0, 0, 1, 1], [], []>} : vector<8x4xf32>, vector<4x256xf32>, vector<8x256xf32> -> vector<8x256xf32>
    %49 = arith.addf %43, %48 : vector<8x256xf32>
    %c0_54 = arith.constant 0 : index
    %c2_55 = arith.constant 2 : index
    %c1_56 = arith.constant 1 : index
    %50 = vector.load %arg5[%c0_54, %c2_55, %c1_56] : memref<4x18x18xf32, #tpu.memory_space<vmem>>, vector<4x16x16xf32>
    %c7 = arith.constant 7 : index
    %c0_57 = arith.constant 0 : index
    %c0_58 = arith.constant 0 : index
    %51 = vector.load %arg2[%c7, %c0_57, %c0_58] : memref<9x8x4xf32, #tpu.memory_space<vmem>>, vector<1x8x4xf32>
    %52 = vector.shape_cast %51 : vector<1x8x4xf32> to vector<8x4xf32>
    %53 = vector.shape_cast %50 : vector<4x16x16xf32> to vector<4x256xf32>
    %cst_59 = arith.constant dense<0.000000e+00> : vector<8x256xf32>
    %54 = tpu.matmul %52, %53, %cst_59 {dimension_numbers = #tpu.dot_dimension_numbers<[1], [0], [0], [1], [0, 0, 1, 1], [], []>} : vector<8x4xf32>, vector<4x256xf32>, vector<8x256xf32> -> vector<8x256xf32>
    %55 = arith.addf %49, %54 : vector<8x256xf32>
    %c0_60 = arith.constant 0 : index
    %c2_61 = arith.constant 2 : index
    %c2_62 = arith.constant 2 : index
    %56 = vector.load %arg5[%c0_60, %c2_61, %c2_62] : memref<4x18x18xf32, #tpu.memory_space<vmem>>, vector<4x16x16xf32>
    %c8 = arith.constant 8 : index
    %c0_63 = arith.constant 0 : index
    %c0_64 = arith.constant 0 : index
    %57 = vector.load %arg2[%c8, %c0_63, %c0_64] : memref<9x8x4xf32, #tpu.memory_space<vmem>>, vector<1x8x4xf32>
    %58 = vector.shape_cast %57 : vector<1x8x4xf32> to vector<8x4xf32>
    %59 = vector.shape_cast %56 : vector<4x16x16xf32> to vector<4x256xf32>
    %cst_65 = arith.constant dense<0.000000e+00> : vector<8x256xf32>
    %60 = tpu.matmul %58, %59, %cst_65 {dimension_numbers = #tpu.dot_dimension_numbers<[1], [0], [0], [1], [0, 0, 1, 1], [], []>} : vector<8x4xf32>, vector<4x256xf32>, vector<8x256xf32> -> vector<8x256xf32>
    %61 = arith.addf %55, %60 : vector<8x256xf32>
    %c0_66 = arith.constant 0 : index
    %c0_67 = arith.constant 0 : index
    %c0_68 = arith.constant 0 : index
    %62 = vector.load %arg4[%c0_66, %c0_67, %c0_68] : memref<1x8x256xf32, #tpu.memory_space<vmem>>, vector<1x8x256xf32>
    %63 = vector.shape_cast %62 : vector<1x8x256xf32> to vector<8x256xf32>
    %64 = vector.shape_cast %61 : vector<8x256xf32> to vector<1x8x256xf32>
    tpu.vector_store %arg4[%c0_66, %c0_67, %c0_68], %64 {strides = array<i32>} : memref<1x8x256xf32, #tpu.memory_space<vmem>>, vector<1x8x256xf32>,
    return
  }
  func.func @transform_0(%arg0: i32) -> (i32, i32, i32, i32) {
    %c0_i32 = arith.constant 0 : i32
    %c0_i32_0 = arith.constant 0 : i32
    %c0_i32_1 = arith.constant 0 : i32
    %c0_i32_2 = arith.constant 0 : i32
    return %arg0, %c0_i32, %c0_i32_0, %c0_i32_1 : i32, i32, i32, i32
  }
  func.func @transform_1(%arg0: i32) -> (i32, i32, i32) {
    %c0_i32 = arith.constant 0 : i32
    %c0_i32_0 = arith.constant 0 : i32
    %c0_i32_1 = arith.constant 0 : i32
    %c0_i32_2 = arith.constant 0 : i32
    return %c0_i32, %c0_i32_0, %c0_i32_1 : i32, i32, i32
  }
  func.func @transform_2(%arg0: i32) -> (i32, i32) {
    %c0_i32 = arith.constant 0 : i32
    %c0_i32_0 = arith.constant 0 : i32
    %c0_i32_1 = arith.constant 0 : i32
    return %c0_i32, %c0_i32_0 : i32, i32
  }
  func.func @transform_3(%arg0: i32) -> (i32, i32, i32) {
    %c0_i32 = arith.constant 0 : i32
    %c0_i32_0 = arith.constant 0 : i32
    %c0_i32_1 = arith.constant 0 : i32
    return %arg0, %c0_i32, %c0_i32_0 : i32, i32, i32
  }
}

</mosaic_0001>

<bundles_post_ra>
// kernel: tpu_custom_call.1
= control target key start
LH: loop header
LB: loop body
LE: loop exit
PB: predicated region body
PF: predicated region fallthrough
CT: control target
= control target key end

     0   :  { %8 = vsyncpa [#allocation4], 0  ;;  %s4904_s0 = inlined_call_operand.hbm [shape: f32[2,4,16,16], index: 0, kind: input, shape index: {}]   ;;  %s4905_s1 = inlined_call_operand.vmem [shape: f32[9,8,4], index: 1, kind: input, shape index: {}]   ;;  %s4906_s2 = inlined_call_operand.vmem [shape: f32[8,1], index: 2, kind: input, shape index: {}]   ;;  %s4907_s3 = inlined_call_operand.hbm [shape: f32[2,8,256], index: 3, kind: output, shape index: {}]  }
   0x1   :  { %10 = vsyncpa [#allocation4 + $0x1], 0 }
   0x2   :  { %11 = vsyncpa [#allocation5], 0 }
   0x3   :  { %13 = vsyncpa [#allocation5 + $0x1], 0  ;;  %s3523_s12 = smov 0   ;;  %s3525_s13 = smov 0  }
   0x4   :  { %s3527_s14 = smov 0   ;;  %s3529_s15 = smov 0  }
   0x5 LB: > { %s3544_s16 = sadd.s32 4294967295, %s3483_s15   ;;  %s3227_s17 = sadd.s32 4294967294, %s3483_s15   ;;  %s3483_s15 = sphi %s3529_s15, %s4964_s15   ;;  %s3479_s14 = sphi %s3527_s14, %s4963_s14   ;;  %s3475_s13 = sphi %s3525_s13, %s4962_s13   ;;  %s3471_s12 = sphi %s3523_s12, %s4961_s12  }
   0x6   : > { %s3548_s18 = sadd.s32 1, %s3483_s15   ;;  %s26_s19 = sadd.s32 1, %s3479_s14 }
   0x7   : > { %s23_s20 = ssub.s32 %s3483_s15, %s3548_s18  ;;  %p33_p0 = scmp.ne.s32.totalorder %s3479_s14, %s3475_s13 }
   0x8   : > { %p24_p1 = scmp.eq.s32.totalorder %s23_s20, 0  ;;  %p34_p2 = scmp.eq.s32.totalorder %s3483_s15, 0 }
   0x9   : > { %p39_p3 = scmp.ne.s32.totalorder %s3475_s13, %s3471_s12  ;;  %p40_p4 = scmp.eq.s32.totalorder %s3544_s16, 0 }
   0xa   : > { %s3560_s21 = scalar_select %p24_p1, %s3479_s14, %s26_s19  }
   0xb   : > { %p3562_p5 = por %p34_p2, %p33_p0  ;;  %p3566_p6 = por %p40_p4, %p39_p3 }
   0xc   : > { %p105_p7 = scmp.eq.s32.totalorder %s3544_s16, 1  ;;  %p111_p8 = scmp.eq.s32.totalorder %s3227_s17, 1 }
   0xd   : > { %p3308_p10 = scmp.lt.s32.totalorder %s3483_s15, 2  ;;  %s137_s26 = sand.u32 1, %s3479_s14  }
   0xe   : > { %p3573_p11 = por %p105_p7, %p33_p0  ;;  %p3577_p12 = por %p111_p8, %p39_p3 }
   0xf   : > { %s3276_s27 = sshll.u32 %s3483_s15, 10  ;;  %s3230_s28 = sshll.u32 %s137_s26, 6 }
  0x10   : > { %s4922_s24 = scalar_select %p3573_p11, 1, 0 }
  0x11   : > { %s4923_s25 = scalar_select %p3577_p12, 1, 0 }
  0x12   : > { %s3586_s4 = scalar_lea.hbm %s4904_s0, %s3276_s27  ;;  %s141_s5 = scalar_lea.vmem [#allocation3], %s3230_s28 }
  0x13   : > { %s148_s6 = sshll.u32 %s141_s5, 4  ;;  %p3590_p13 = pnand %p3308_p10, %p3562_p5  ;;  %s3594_s6 = int_to_ptr.vmem [resolvable:$true] %s148_s6 }
  0x14   : > { %s3596_s8 = scalar_lea.sflag [#allocation4], %s137_s26  ;;  %s3387_s9 = scalar_lea.hbm %s3586_s4, 1024 }
  0x15   : > { %p3388_p0 = scmp.ne.s32.totalorder %s3586_s4, %s3387_s9  ;;  %p3389_p1 = pneg %p3590_p13 }
  0x16   : > { %s3392_s17 = scalar_lea.hbm %s4904_s0, 2048  ;;  %p3393_p4 = scmp.lt.u32.totalorder %s3586_s4, %s4904_s0 }
  0x17   : > { %p3390_p2 = pnand %p3389_p1, %p3388_p0  ;;  %p3394_p5 = scmp.lt.u32.totalorder %s3392_s17, %s3387_s9 }
  0x18   : > { %p3396_p8 = scmp.lt.u32.totalorder %s3387_s9, %s3586_s4 }
  0x19   : > { %p3391_p3 = pneg %p3390_p2  ;;  %p3395_p7 = por %p3394_p5, %p3393_p4 }
  0x1b   : > { %p3397_p10 = por %p3396_p8, %p3395_p7 }
  0x1d   : > { %p3398_p9 = pnand %p3397_p10, %p3391_p3 }
  0x1f   : > { %3401 = shalt.err (!%p3398_p9)
}
  0x20   : > { %s3402_s22 = scalar_lea.vmem %s3594_s6, 1024  ;;  %s3485_s26 = smov [#allocation3]  }
  0x21   : > { %p3403_p0 = scmp.ne.s32.totalorder %s3594_s6, %s3402_s22  ;;  %s3407_s27 = sshll.u32 %s3485_s26, 4  ;;  %s3408_s27 = int_to_ptr.vmem [resolvable:$false] %s3407_s27 }
  0x22   : > { %s3409_s28 = scalar_lea.vmem %s3408_s27, 2048  ;;  %p3410_p11 = scmp.lt.s32.totalorder %s3594_s6, %s3408_s27 }
  0x23   : > { %p3405_p2 = pnand %p3403_p0, %p3389_p1  ;;  %p3411_p4 = scmp.lt.s32.totalorder %s3409_s28, %s3402_s22 }
  0x25   : > { %p3406_p12 = pneg %p3405_p2  ;;  %p3412_p5 = por %p3411_p4, %p3410_p11 }
  0x27   : > { %p3413_p7 = pnand %p3412_p5, %p3406_p12 }
  0x29   : > { %3416 = shalt.err (!%p3413_p7)
}
  0x2a   : > { %s3486_s29 = smov 128   ;;  %s3487_s30 = smov 8  }
  0x2b   : > { %3303 = dma.hbm_to_vmem [thread:$0]  (!%p3590_p13), %s3586_s4, 1024, %s3594_s6, %s3596_s8, %s3486_s29, %s3486_s29, %s3487_s30  }
  0x2c   : > { %p3233_p9 = scmp.ge.s32.totalorder %s3483_s15, 1  ;;  %p156_p1 = scmp.lt.s32.totalorder %s3483_s15, 3 }
  0x2e   : > { %p157_p3 = pnand %p3233_p9, %p156_p1 }
  0x30   : > { %160 = sbr.rel (%p157_p3) target bundleno = 878 (0x36e), region = 32 }
  0x37   : > { %s3627_s5 = sand.u32 1, %s3475_s13  }
  0x38   : > { %s3234_s9 = sshll.u32 %s3627_s5, 6  ;;  %s163_s10 = scalar_lea.sflag [#allocation4], %s3627_s5 }
  0x39   : > { %s3631_s11 = scalar_lea.vmem [#allocation3], %s3234_s9 }
  0x3a   : > { %3462 = dma.done.wait (%p3566_p6), %s163_s10, 1024  }
  0x3b   : > { %3464 = vsyncadd (%p3566_p6), %s163_s10, 4294966272  ;;  %vm189_vm0 = vcmask 146432   ;;  %vm192_vm1 = vcmask 140288   ;;  %v4910_v0 = vmov 0.0   ;;  %v208_v1 = vld [vmem:[%s3631_s11 + $0x28] sm:$0xff]  ;;  %s3489_s23 = smov 1   ;;  %v272_v15 = vlaneseq }
  0x3c   : > { %198 = vst.msk [vmem:[#allocation2 + $0x38] sm:$0xff] %vm189_vm0, %v4910_v0  ;;  %190 = vst.msk [vmem:[#allocation2] sm:$0xff] %vm189_vm0, %v4910_v0  ;;  %1843 = vmatprep.mubr.f32.mxu0 %v4910_v0  ;;  %555 = vmatprep.mubr.f32.mxu1 %v4910_v0  ;;  %v204_v2 = vld [vmem:[%s3631_s11 + $0x8] sm:$0xff]  ;;  %v210_v3 = vld [vmem:[%s3631_s11 + $0x38] sm:$0xff]  ;;  %vm243_vm2 = vcmask 138248   ;;  %s3491_s4 = smov 127  }
  0x3d   : > { %199 = vst.msk [vmem:[#allocation2 + $0x40] sm:$0x3] %vm192_vm1, %v4910_v0  ;;  %193 = vst.msk [vmem:[#allocation2 + $0x10] sm:$0x3] %vm192_vm1, %v4910_v0  ;;  %229 = vrot.lane.b32.xlu1 %v208_v1, %s3489_s23  ;;  %221 = vrot.lane.b32.xlu0 %v204_v2, %s3489_s23  ;;  %v206_v4 = vld [vmem:[%s3631_s11 + $0x18] sm:$0xff]  ;;  %v205_v5 = vld [vmem:[%s3631_s11 + $0x10] sm:$0xff] }
  0x3e   : > { %191 = vst.msk [vmem:[#allocation2 + $0x8] sm:$0xff] %vm189_vm0, %v4910_v0  ;;  %194 = vst.msk [vmem:[#allocation2 + $0x18] sm:$0xff] %vm189_vm0, %v4910_v0  ;;  %v203_v6 = vld [vmem:[%s3631_s11] sm:$0xff]  ;;  %v209_v7 = vld [vmem:[%s3631_s11 + $0x30] sm:$0xff]  ;;  %v3490_v13 = vmov 1983009808  }
  0x3f   : > { %195 = vst.msk [vmem:[#allocation2 + $0x20] sm:$0xff] %vm189_vm0, %v4910_v0  ;;  %197 = vst.msk [vmem:[#allocation2 + $0x30] sm:$0xff] %vm189_vm0, %v4910_v0  ;;  %v207_v8 = vld [vmem:[%s3631_s11 + $0x20] sm:$0xff]  ;;  %v270_v14 = vunpack.c.l.s4 %v3490_v13  ;;  %v3665_v21 = vshrl.u32 %v272_v15, 7  ;;  %s3492_s6 = smov 126   ;;  %s3494_s7 = smov 64  }
  0x40   : > { %196 = vst.msk [vmem:[#allocation2 + $0x28] sm:$0x3] %vm192_vm1, %v4910_v0  ;;  %202 = vst.msk [vmem:[#allocation2 + $0x58] sm:$0x3] %vm192_vm1, %v4910_v0  ;;  %v3493_v61 = vmov 1934713408  }
  0x41   : > { %200 = vst.msk [vmem:[#allocation2 + $0x48] sm:$0xff] %vm189_vm0, %v4910_v0  ;;  %201 = vst.msk [vmem:[#allocation2 + $0x50] sm:$0xff] %vm189_vm0, %v4910_v0  ;;  %233 = vrot.lane.b32.xlu1 %v210_v3, %s3489_s23  ;;  %225 = vrot.lane.b32.xlu0 %v206_v4, %s3489_s23  ;;  %v271_v20 = vunpack.c.0.s8 %v270_v14  ;;  %v302_v62 = vunpack.c.l.s4 %v3493_v61  ;;  %s3495_s8 = smov 32   ;;  %s3496_s17 = smov 96   ;;  %vm459_vm3 = vcmask 130048   ;;  %vm461_vm4 = vcmask 261120  }
  0x42   : > { %s3497_s19 = smov 16   ;;  %s3498_s20 = smov 48   ;;  %vm463_vm5 = vcmask 392192   ;;  %vm465_vm6 = vcmask 523264   ;;  %vm467_vm7 = vcmask 654336   ;;  %vm469_vm8 = vcmask 785408  }
  0x43   : > { %v3675_v28 = vsub.s32 %v271_v20, %v3665_v21  ;;  %s3499_s22 = smov 80   ;;  %s3500_s26 = smov 112   ;;  %vm471_vm9 = vcmask 916480   ;;  %vm484_vm10 = vcmask 1043456   ;;  %vm480_vm11 = vcmask 31744  }
  0x44   : > { %s3235_s30 = sshll.u32 %s3627_s5, 4  ;;  %s3277_s9 = sshll.u32 %s3544_s16, 8 }
  0x45   : > { %223 = vrot.lane.b32.xlu1 %v205_v5, %s3489_s23  ;;  %219 = vrot.lane.b32.xlu0 %v203_v6, %s3489_s23  ;;  %v303_v6 = vunpack.c.0.s8 %v302_v62  ;;  %s188_s10 = scalar_lea.vmem [#allocation6], %s3235_s30  ;;  %s3143_s16 = scalar_lea.sflag [#allocation5], %s3627_s5 }
  0x46   : > { %s3157_s11 = sshll.u32 %s188_s10, 4  ;;  %p4958_p11 = scmp.ne.s32.totalorder %s4922_s24, 0  ;;  %s4862_s11 = int_to_ptr.vmem [resolvable:$true] %s3157_s11 }
  0x49   : > { %231 = vrot.lane.b32.xlu1 %v209_v7, %s3489_s23  ;;  %227 = vrot.lane.b32.xlu0 %v207_v8, %s3489_s23 }
  0xaf   : > { %v230_v9 = vpop.permute.xlu1 %229  ;;  %v222_v10 = vpop.permute.xlu0 %221 }
  0xb0   : > { %249 = vst.msk [vmem:[#allocation2 + $0x39] sm:$0xff] %vm243_vm2, %v230_v9  ;;  %245 = vst.msk [vmem:[#allocation2 + $0x9] sm:$0xff] %vm243_vm2, %v222_v10 }
  0xb3   : > { %v234_v11 = vpop.permute.xlu1 %233  ;;  %v226_v12 = vpop.permute.xlu0 %225 }
  0xb4   : > { %251 = vst.msk [vmem:[#allocation2 + $0x51] sm:$0xff] %vm243_vm2, %v234_v11  ;;  %247 = vst.msk [vmem:[#allocation2 + $0x21] sm:$0xff] %vm243_vm2, %v226_v12  ;;  %v3805_v12 = vsub.s32 %v303_v6, %v3665_v21 }
  0xb7   : > { %v224_v16 = vpop.permute.xlu1 %223  ;;  %v220_v17 = vpop.permute.xlu0 %219  ;;  %v1523_v18 = vld [vmem:[#allocation2 + $0x9] sm:$0xff]  ;;  %v3670_v22 = vld [vmem:[#allocation2 + $0x3a] sm:$0xff] }
  0xb8   : > { %v3663_v19 = vld [vmem:[#allocation2 + $0xa] sm:$0xff]  ;;  %246 = vst.msk [vmem:[#allocation2 + $0x19] sm:$0xff] %vm243_vm2, %v224_v16  ;;  %244 = vst.msk [vmem:[#allocation2 + $0x1] sm:$0xff] %vm243_vm2, %v220_v17  ;;  %1542 = vrot.lane.b32.xlu0 %v1523_v18, %s3491_s4  ;;  %v1527_v23 = vld [vmem:[#allocation2 + $0x39] sm:$0xff] }
  0xb9   : > { %v2261_v29 = vcombine.high %v3663_v19, %v3670_v22 }
  0xbb   : > { %v232_v24 = vpop.permute.xlu1 %231  ;;  %v228_v25 = vpop.permute.xlu0 %227  ;;  %v1525_v26 = vld [vmem:[#allocation2 + $0x21] sm:$0xff]  ;;  %v3683_v30 = vld [vmem:[#allocation2 + $0x52] sm:$0xff]  ;;  %v3688_v34 = vrot.slane %v2261_v29, %v3675_v28 }
  0xbc   : > { %v3672_v27 = vld [vmem:[#allocation2 + $0x22] sm:$0xff]  ;;  %250 = vst.msk [vmem:[#allocation2 + $0x49] sm:$0xff] %vm243_vm2, %v232_v24  ;;  %248 = vst.msk [vmem:[#allocation2 + $0x31] sm:$0xff] %vm243_vm2, %v228_v25  ;;  %1546 = vrot.lane.b32.xlu1 %v1525_v26, %s3491_s4  ;;  %1550 = vrot.lane.b32.xlu0 %v1527_v23, %s3491_s4  ;;  %v1529_v31 = vld [vmem:[#allocation2 + $0x51] sm:$0xff] }
  0xbd   : > { %v2277_v32 = vcombine.high %v3672_v27, %v3683_v30 }
  0xbf   : > { %v1522_v33 = vld [vmem:[#allocation2 + $0x1] sm:$0xff]  ;;  %v3691_v35 = vrot.slane %v2277_v32, %v3675_v28  ;;  %v1524_v36 = vld [vmem:[#allocation2 + $0x19] sm:$0xff] }
  0xc0   : > { %1554 = vrot.lane.b32.xlu1 %v1529_v31, %s3491_s4  ;;  %1540 = vrot.lane.b32.xlu0 %v1522_v33, %s3491_s4  ;;  %v3699_v40 = vld [vmem:[#allocation2 + $0x8] sm:$0xff]  ;;  %v3709_v45 = vld [vmem:[#allocation2 + $0x20] sm:$0xff]  ;;  %v566_v52 = vld [vmem:[#allocation2 + $0x18] sm:$0xff] }
  0xc1   : > { %v2308_v37 = vcombine.low %v3688_v34, %v3691_v35  ;;  %v2309_v38 = vcombine.high %v3688_v34, %v3691_v35  ;;  %v564_v51 = vld [vmem:[#allocation2] sm:$0xff] }
  0xc2   : > { %v3762_v55 = vld [vmem:[#allocation2 + $0x2] sm:$0xff]  ;;  %v3768_v56 = vld [vmem:[#allocation2 + $0x1a] sm:$0xff] }
  0xc3   : > { %v1526_v39 = vld [vmem:[#allocation2 + $0x31] sm:$0xff]  ;;  %v1528_v44 = vld [vmem:[#allocation2 + $0x49] sm:$0xff] }
  0xc4   : > { %v3701_v41 = vld [vmem:[#allocation2 + $0x38] sm:$0xff]  ;;  %1544 = vrot.lane.b32.xlu1 %v1524_v36, %s3491_s4  ;;  %1548 = vrot.lane.b32.xlu0 %v1526_v39, %s3491_s4  ;;  %v3705_v42 = vld [vmem:[#allocation2 + $0x50] sm:$0xff]  ;;  %v570_v54 = vld [vmem:[#allocation2 + $0x48] sm:$0xff] }
  0xc5   : > { %v336_v43 = vcombine.high %v3699_v40, %v3701_v41  ;;  %v352_v47 = vcombine.high %v3709_v45, %v3705_v42  ;;  %v568_v53 = vld [vmem:[#allocation2 + $0x30] sm:$0xff]  ;;  %v284_v60 = vcombine.high %v566_v52, %v570_v54  ;;  %v335_v63 = vcombine.low %v3699_v40, %v3701_v41 }
  0xc6   : > { %v3770_v57 = vld [vmem:[#allocation2 + $0x32] sm:$0xff]  ;;  %v3776_v58 = vld [vmem:[#allocation2 + $0x4a] sm:$0xff]  ;;  %v268_v59 = vcombine.high %v564_v51, %v568_v53  ;;  %v351_v1 = vcombine.low %v3709_v45, %v3705_v42  ;;  %v267_v4 = vcombine.low %v564_v51, %v568_v53  ;;  %v283_v5 = vcombine.low %v566_v52, %v570_v54 }
  0xc7   : > { %v3712_v46 = vrot.slane %v336_v43, %v3675_v28  ;;  %v3719_v48 = vrot.slane %v352_v47, %v3675_v28  ;;  %v298_v3 = vrot.slane %v284_v60, %v3675_v28  ;;  %v343_v7 = vrot.slane %v335_v63, %v3675_v28 }
  0xc8   : > { %1552 = vrot.lane.b32.xlu1 %v1528_v44, %s3491_s4  ;;  %1872 = vrot.lane.b32.xlu0 %v1523_v18, %s3492_s6  ;;  %v282_v2 = vrot.slane %v268_v59, %v3675_v28  ;;  %v359_v9 = vrot.slane %v351_v1, %v3675_v28  ;;  %v275_v10 = vrot.slane %v267_v4, %v3675_v28 }
  0xc9   : > { %v383_v49 = vcombine.low %v3712_v46, %v3719_v48  ;;  %v384_v50 = vcombine.high %v3712_v46, %v3719_v48  ;;  %v291_v11 = vrot.slane %v283_v5, %v3675_v28  ;;  %v2208_v32 = vcombine.low %v3768_v56, %v3776_v58 }
  0xca   : > { %v315_v8 = vcombine.low %v282_v2, %v298_v3  ;;  %v368_v14 = vcombine.high %v343_v7, %v359_v9  ;;  %v316_v15 = vcombine.high %v282_v2, %v298_v3  ;;  %v367_v25 = vcombine.low %v343_v7, %v359_v9 }
  0xcb   : > { %v299_v16 = vcombine.low %v275_v10, %v291_v11  ;;  %v300_v20 = vcombine.high %v275_v10, %v291_v11  ;;  %v2260_v43 = vcombine.low %v3663_v19, %v3670_v22  ;;  %v2193_v62 = vcombine.high %v3762_v55, %v3770_v57 }
  0xcc   : > { %1876 = vrot.lane.b32.xlu1 %v1525_v26, %s3492_s6  ;;  %1880 = vrot.lane.b32.xlu0 %v1527_v23, %s3492_s6  ;;  %v323_v13 = vrot.slane %v315_v8, %v3805_v12  ;;  %v382_v17 = vrot.slane %v368_v14, %v3805_v12  ;;  %v330_v18 = vrot.slane %v316_v15, %v3805_v12 }
  0xcd   : > { %v3814_v23 = vrot.slane %v299_v16, %v3805_v12  ;;  %v314_v21 = vrot.slane %v300_v20, %v3805_v12  ;;  %v391_v26 = vrot.slane %v383_v49, %v3805_v12  ;;  %v2268_v47 = vrot.slane %v2260_v43, %v3675_v28 }
  0xce   : > { %v400_v29 = vcombine.high %v382_v17, %v4910_v0  ;;  %v2209_v63 = vcombine.high %v3768_v56, %v3776_v58  ;;  %v2207_v6 = vrot.slane %v2193_v62, %v3675_v28 }
  0xcf   : > { %v331_v24 = vcombine.high %v3814_v23, %v4910_v0  ;;  %v401_v49 = vcombine.high %v391_v26, %v4910_v0 }
  0xd0   : > { %1884 = vrot.lane.b32.xlu1 %v1529_v31, %s3492_s6  ;;  %1870 = vrot.lane.b32.xlu0 %v1522_v33, %s3492_s6  ;;  %v2192_v31 = vcombine.low %v3762_v55, %v3770_v57  ;;  %v3835_v33 = vrot.slane %v367_v25, %v3805_v12 }
  0xd4   : > { %1874 = vrot.lane.b32.xlu1 %v1524_v36, %s3492_s6  ;;  %1878 = vrot.lane.b32.xlu0 %v1526_v39, %s3492_s6  ;;  %v2276_v36 = vcombine.low %v3672_v27, %v3683_v30  ;;  %v398_v39 = vrot.slane %v384_v50, %v3805_v12  ;;  %v334_v50 = vcombine.high %v330_v18, %v4910_v0 }
  0xd8   : > { %1882 = vrot.lane.b32.xlu1 %v1528_v44, %s3492_s6  ;;  %584 = vrot.lane.b32.xlu0 %v3699_v40, %s3491_s4  ;;  %v399_v44 = vcombine.high %v3835_v33, %v4910_v0 }
  0xdc   : > { %588 = vrot.lane.b32.xlu1 %v3709_v45, %s3491_s4  ;;  %592 = vrot.lane.b32.xlu0 %v3701_v41, %s3491_s4 }
  0xe0   : > { %596 = vrot.lane.b32.xlu1 %v3705_v42, %s3491_s4  ;;  %582 = vrot.lane.b32.xlu0 %v564_v51, %s3491_s4 }
  0xe4   : > { %586 = vrot.lane.b32.xlu1 %v566_v52, %s3491_s4  ;;  %590 = vrot.lane.b32.xlu0 %v568_v53, %s3491_s4 }
  0xe8   : > { %594 = vrot.lane.b32.xlu1 %v570_v54, %s3491_s4  ;;  %914 = vrot.lane.b32.xlu0 %v3699_v40, %s3492_s6  ;;  %v332_v40 = vcombine.high %v314_v21, %v4910_v0 }
  0xec   : > { %918 = vrot.lane.b32.xlu1 %v3709_v45, %s3492_s6  ;;  %922 = vrot.lane.b32.xlu0 %v3701_v41, %s3492_s6  ;;  %v2200_v41 = vrot.slane %v2192_v31, %v3675_v28  ;;  %v333_v45 = vcombine.high %v323_v13, %v4910_v0 }
  0xf0   : > { %926 = vrot.lane.b32.xlu1 %v3705_v42, %s3492_s6  ;;  %912 = vrot.lane.b32.xlu0 %v564_v51, %s3492_s6  ;;  %v2216_v42 = vrot.slane %v2208_v32, %v3675_v28 }
  0xf2   : > { %v2224_v46 = vcombine.low %v2200_v41, %v2216_v42  ;;  %v2225_v61 = vcombine.high %v2200_v41, %v2216_v42 }
  0xf4   : > { %916 = vrot.lane.b32.xlu1 %v566_v52, %s3492_s6  ;;  %920 = vrot.lane.b32.xlu0 %v568_v53, %s3492_s6  ;;  %v3864_v51 = vrot.slane %v2224_v46, %v3805_v12  ;;  %v402_v52 = vcombine.high %v398_v39, %v4910_v0  ;;  %v2239_v5 = vrot.slane %v2225_v61, %v3805_v12 }
  0xf6   : > { %v2256_v60 = vcombine.high %v3864_v51, %v4910_v0  ;;  %v2257_v7 = vcombine.high %v2239_v5, %v4910_v0 }
  0xf8   : > { %924 = vrot.lane.b32.xlu1 %v570_v54, %s3492_s6  ;;  %2500 = vrot.lane.b32.xlu0 %v3663_v19, %s3491_s4 }
  0xfc   : > { %2504 = vrot.lane.b32.xlu1 %v3672_v27, %s3491_s4  ;;  %2508 = vrot.lane.b32.xlu0 %v3670_v22, %s3491_s4 }
 0x100   : > { %2512 = vrot.lane.b32.xlu1 %v3683_v30, %s3491_s4  ;;  %2498 = vrot.lane.b32.xlu0 %v3762_v55, %s3491_s4 }
 0x104   : > { %2502 = vrot.lane.b32.xlu1 %v3768_v56, %s3491_s4  ;;  %2506 = vrot.lane.b32.xlu0 %v3770_v57, %s3491_s4 }
 0x108   : > { %2510 = vrot.lane.b32.xlu1 %v3776_v58, %s3491_s4  ;;  %2830 = vrot.lane.b32.xlu0 %v3663_v19, %s3492_s6 }
 0x10c   : > { %2834 = vrot.lane.b32.xlu1 %v3672_v27, %s3492_s6  ;;  %2838 = vrot.lane.b32.xlu0 %v3670_v22, %s3492_s6  ;;  %v2284_v27 = vrot.slane %v2276_v36, %v3675_v28 }
 0x10e   : > { %v2292_v19 = vcombine.low %v2268_v47, %v2284_v27  ;;  %v2293_v1 = vcombine.high %v2268_v47, %v2284_v27 }
 0x110   : > { %2842 = vrot.lane.b32.xlu1 %v3683_v30, %s3492_s6  ;;  %2828 = vrot.lane.b32.xlu0 %v3762_v55, %s3492_s6  ;;  %v3870_v53 = vrot.slane %v2292_v19, %v3805_v12  ;;  %v2223_v55 = vrot.slane %v2209_v63, %v3675_v28 }
 0x112   : > { %v2324_v4 = vcombine.high %v3870_v53, %v4910_v0  ;;  %v2240_v8 = vcombine.low %v2207_v6, %v2223_v55  ;;  %v2241_v20 = vcombine.high %v2207_v6, %v2223_v55 }
 0x114   : > { %2832 = vrot.lane.b32.xlu1 %v3768_v56, %s3492_s6  ;;  %2836 = vrot.lane.b32.xlu0 %v3770_v57, %s3492_s6  ;;  %v2255_v35 = vrot.slane %v2241_v20, %v3805_v12 }
 0x116   : > { %v2259_v27 = vcombine.high %v2255_v35, %v4910_v0 }
 0x118   : > { %2840 = vrot.lane.b32.xlu1 %v3776_v58, %s3492_s6  ;;  %416 = vrot.lane.b32.xlu0 %v323_v13, %s3494_s7  ;;  %v2307_v58 = vrot.slane %v2293_v1, %v3805_v12  ;;  %v2248_v13 = vrot.slane %v2240_v8, %v3805_v12  ;;  %s4860_s6 = scalar_lea.hbm %s4907_s3, %s3277_s9 }
 0x11a   : > { %v2325_v11 = vcombine.high %v2307_v58, %v4910_v0 }
 0x11c   : > { %436 = vrot.lane.b32.xlu1 %v382_v17, %s3495_s8  ;;  %424 = vrot.lane.b32.xlu0 %v330_v18, %s3496_s17  ;;  %v2316_v17 = vrot.slane %v2308_v37, %v3805_v12  ;;  %v2323_v18 = vrot.slane %v2309_v38, %v3805_v12 }
 0x11e   : > { %v2326_v34 = vcombine.high %v2316_v17, %v4910_v0  ;;  %v2327_v47 = vcombine.high %v2323_v18, %v4910_v0 }
 0x120   : > { %408 = vrot.lane.b32.xlu1 %v314_v21, %s3495_s8  ;;  %404 = vrot.lane.b32.xlu0 %v331_v24, %s3497_s19 }
 0x124   : > { %444 = vrot.lane.b32.xlu1 %v391_v26, %s3494_s7  ;;  %440 = vrot.lane.b32.xlu0 %v400_v29, %s3498_s20 }
 0x128   : > { %452 = vrot.lane.b32.xlu1 %v398_v39, %s3496_s17  ;;  %412 = vrot.lane.b32.xlu0 %v332_v40, %s3498_s20  ;;  %v2258_v39 = vcombine.high %v2248_v13, %v4910_v0 }
 0x12a   : > { %v3851_v30 = vpop.permute.xlu0 %1542 }
 0x12c   : > { %432 = vrot.lane.b32.xlu1 %v399_v44, %s3497_s19  ;;  %420 = vrot.lane.b32.xlu0 %v333_v45, %s3499_s22 }
 0x12e   : > { %v1547_v22 = vpop.permute.xlu1 %1546  ;;  %v3859_v48 = vpop.permute.xlu0 %1550 }
 0x12f   : > { %v1632_v21 = vcombine.low %v3851_v30, %v3859_v48  ;;  %v1633_v38 = vcombine.high %v3851_v30, %v3859_v48 }
 0x130   : > { %448 = vrot.lane.b32.xlu1 %v401_v49, %s3499_s22  ;;  %428 = vrot.lane.b32.xlu0 %v334_v50, %s3500_s26 }
 0x131   : > { %v3931_v31 = vrot.slane %v1632_v21, %v3675_v28  ;;  %v1647_v44 = vrot.slane %v1633_v38, %v3675_v28 }
 0x132   : > { %v1555_v54 = vpop.permute.xlu1 %1554  ;;  %v3872_v59 = vpop.permute.xlu0 %1540 }
 0x133   : > { %v1648_v14 = vcombine.low %v1547_v22, %v1555_v54  ;;  %v1649_v24 = vcombine.high %v1547_v22, %v1555_v54 }
 0x134   : > { %456 = vrot.lane.b32.xlu1 %v402_v52, %s3500_s26  ;;  %2329 = vrot.lane.b32.xlu0 %v2256_v60, %s3497_s19 }
 0x135   : > { %v3920_v25 = vrot.slane %v1648_v14, %v3675_v28  ;;  %v1663_v36 = vrot.slane %v1649_v24, %v3675_v28 }
 0x136   : > { %v1545_v2 = vpop.permute.xlu1 %1544  ;;  %v3882_v3 = vpop.permute.xlu0 %1548 }
 0x137   : > { %v1564_v32 = vcombine.low %v3872_v59, %v3882_v3  ;;  %v1665_v30 = vcombine.high %v3931_v31, %v3920_v25  ;;  %v1565_v45 = vcombine.high %v3872_v59, %v3882_v3  ;;  %v1680_v19 = vcombine.low %v1647_v44, %v1663_v36 }
 0x138   : > { %2357 = vrot.lane.b32.xlu1 %v2324_v4, %s3497_s19  ;;  %2333 = vrot.lane.b32.xlu0 %v2239_v5, %s3495_s8  ;;  %v1681_v63 = vcombine.high %v1647_v44, %v1663_v36 }
 0x139   : > { %v3951_v46 = vrot.slane %v1564_v32, %v3675_v28  ;;  %v3963_v52 = vrot.slane %v1665_v30, %v3805_v12  ;;  %v1579_v59 = vrot.slane %v1565_v45, %v3675_v28  ;;  %v3975_v62 = vrot.slane %v1680_v19, %v3805_v12 }
 0x13a   : > { %v1553_v56 = vpop.permute.xlu1 %1552  ;;  %v3891_v57 = vpop.permute.xlu0 %1872 }
 0x13b   : > { %v1580_v26 = vcombine.low %v1545_v2, %v1553_v56  ;;  %v1581_v40 = vcombine.high %v1545_v2, %v1553_v56 }
 0x13c   : > { %2361 = vrot.lane.b32.xlu1 %v2307_v58, %s3495_s8  ;;  %2337 = vrot.lane.b32.xlu0 %v2257_v7, %s3498_s20 }
 0x13d   : > { %v3940_v41 = vrot.slane %v1580_v26, %v3675_v28  ;;  %v1595_v22 = vrot.slane %v1581_v40, %v3675_v28 }
 0x13e   : > { %v3897_v9 = vpop.permute.xlu1 %1876  ;;  %v3899_v10 = vpop.permute.xlu0 %1880 }
 0x13f   : > { %v1597_v54 = vcombine.high %v3951_v46, %v3940_v41  ;;  %v1962_v60 = vcombine.low %v3891_v57, %v3899_v10  ;;  %v1612_v6 = vcombine.low %v1579_v59, %v1595_v22  ;;  %v1963_v55 = vcombine.high %v3891_v57, %v3899_v10 }
 0x140   : > { %2365 = vrot.lane.b32.xlu1 %v2325_v11, %s3498_s20  ;;  %2341 = vrot.lane.b32.xlu0 %v2248_v13, %s3494_s7  ;;  %v1613_v57 = vcombine.high %v1579_v59, %v1595_v22 }
 0x141   : > { %v3984_v5 = vrot.slane %v1597_v54, %v3805_v12  ;;  %v3989_v56 = vrot.slane %v1962_v60, %v3675_v28 }
 0x142   : > { %v1885_v15 = vpop.permute.xlu1 %1884  ;;  %v3905_v16 = vpop.permute.xlu0 %1870  ;;  %v4033_v38 = vrot.slane %v1613_v57, %v3805_v12 }
 0x143   : > { %v1978_v48 = vcombine.low %v3897_v9, %v1885_v15  ;;  %v1979_v61 = vcombine.high %v3897_v9, %v1885_v15  ;;  %v4000_v9 = vrot.slane %v1681_v63, %v3805_v12  ;;  %v4007_v15 = vrot.slane %v1612_v6, %v3805_v12 }
 0x144   : > { %2369 = vrot.lane.b32.xlu1 %v2316_v17, %s3494_s7  ;;  %2377 = vrot.lane.b32.xlu0 %v2323_v18, %s3496_s17  ;;  %v1977_v18 = vrot.slane %v1963_v55, %v3675_v28 }
 0x145   : > { %v3978_v1 = vrot.slane %v1978_v48, %v3675_v28  ;;  %v1993_v7 = vrot.slane %v1979_v61, %v3675_v28 }
 0x146   : > { %v3922_v29 = vpop.permute.xlu1 %1874  ;;  %v3924_v37 = vpop.permute.xlu0 %1878 }
 0x147   : > { %v1894_v58 = vcombine.low %v3905_v16, %v3924_v37  ;;  %v1995_v17 = vcombine.high %v3989_v56, %v3978_v1  ;;  %v1895_v20 = vcombine.high %v3905_v16, %v3924_v37  ;;  %v2011_v60 = vcombine.high %v1977_v18, %v1993_v7 }
 0x148   : > { %2373 = vrot.lane.b32.xlu1 %v2326_v34, %s3499_s22  ;;  %2349 = vrot.lane.b32.xlu0 %v2255_v35, %s3496_s17 }
 0x149   : > { %v4015_v21 = vrot.slane %v1894_v58, %v3675_v28  ;;  %v4030_v37 = vrot.slane %v1995_v17, %v3805_v12  ;;  %v1909_v36 = vrot.slane %v1895_v20, %v3675_v28 }
 0x14a   : > { %v1883_v42 = vpop.permute.xlu1 %1882  ;;  %v3942_v43 = vpop.permute.xlu0 %584 }
 0x14b   : > { %v1910_v2 = vcombine.low %v3922_v29, %v1883_v42  ;;  %v1911_v8 = vcombine.high %v3922_v29, %v1883_v42  ;;  %v2010_v29 = vcombine.low %v1977_v18, %v1993_v7  ;;  %v4091_v7 = vrot.slane %v2011_v60, %v3805_v12 }
 0x14c   : > { %2345 = vrot.lane.b32.xlu1 %v2258_v39, %s3499_s22  ;;  %2353 = vrot.lane.b32.xlu0 %v2259_v27, %s3500_s26 }
 0x14d   : > { %v4003_v10 = vrot.slane %v1910_v2, %v3675_v28  ;;  %v1925_v26 = vrot.slane %v1911_v8, %v3675_v28  ;;  %v4047_v27 = vrot.slane %v2010_v29, %v3805_v12 }
 0x14e   : > { %v3958_v49 = vpop.permute.xlu1 %588  ;;  %v3960_v50 = vpop.permute.xlu0 %592 }
 0x14f   : > { %v674_v24 = vcombine.low %v3942_v43, %v3960_v50  ;;  %v1927_v32 = vcombine.high %v4015_v21, %v4003_v10  ;;  %v1942_v30 = vcombine.low %v1909_v36, %v1925_v26  ;;  %v675_v54 = vcombine.high %v3942_v43, %v3960_v50 }
 0x150   : > { %2381 = vrot.lane.b32.xlu1 %v2327_v47, %s3500_s26  ;;  %1733 = vrot.lane.b32.xlu0 %v3963_v52, %s3495_s8  ;;  %v1943_v58 = vcombine.high %v1909_v36, %v1925_v26 }
 0x151   : > { %v4039_v40 = vrot.slane %v674_v24, %v3675_v28  ;;  %v4058_v22 = vrot.slane %v1927_v32, %v3805_v12  ;;  %v689_v6 = vrot.slane %v675_v54, %v3675_v28 }
 0x152   : > { %v597_v3 = vpop.permute.xlu1 %596  ;;  %v3981_v4 = vpop.permute.xlu0 %582  ;;  %v4121_v36 = vrot.slane %v1943_v58, %v3805_v12 }
 0x153   : > { %v690_v11 = vcombine.low %v3958_v49, %v597_v3  ;;  %v691_v44 = vcombine.high %v3958_v49, %v597_v3  ;;  %v4072_v49 = vrot.slane %v1942_v30, %v3805_v12 }
 0x154   : > { %1705 = vrot.lane.b32.xlu1 %v3984_v5, %s3495_s8  ;;  %1741 = vrot.lane.b32.xlu0 %v3975_v62, %s3494_s7 }
 0x155   : > { %v4025_v34 = vrot.slane %v690_v11, %v3675_v28  ;;  %v705_v61 = vrot.slane %v691_v44, %v3675_v28  ;;  %v1664_v44 = vcombine.low %v3931_v31, %v3920_v25  ;;  %v1596_v31 = vcombine.low %v3951_v46, %v3940_v41 }
 0x156   : > { %v587_v13 = vpop.permute.xlu1 %586  ;;  %v591_v14 = vpop.permute.xlu0 %590 }
 0x157   : > { %v606_v42 = vcombine.low %v3981_v4, %v591_v14  ;;  %v707_v48 = vcombine.high %v4039_v40, %v4025_v34  ;;  %v607_v55 = vcombine.high %v3981_v4, %v591_v14  ;;  %v722_v14 = vcombine.low %v689_v6, %v705_v61 }
 0x158   : > { %1713 = vrot.lane.b32.xlu1 %v4007_v15, %s3494_s7  ;;  %1749 = vrot.lane.b32.xlu0 %v4000_v9, %s3496_s17  ;;  %v723_v20 = vcombine.high %v689_v6, %v705_v61  ;;  %v4159_v25 = vrot.slane %v1664_v44, %v3805_v12 }
 0x159   : > { %v4065_v59 = vrot.slane %v606_v42, %v3675_v28  ;;  %v4080_v43 = vrot.slane %v707_v48, %v3805_v12  ;;  %v621_v17 = vrot.slane %v607_v55, %v3675_v28  ;;  %v4118_v32 = vrot.slane %v722_v14, %v3805_v12 }
 0x15a   : > { %v595_v35 = vpop.permute.xlu1 %594  ;;  %v4027_v16 = vpop.permute.xlu0 %914  ;;  %v4137_v48 = vrot.slane %v723_v20, %v3805_v12  ;;  %v1696_v20 = vcombine.high %v4159_v25, %v4910_v0 }
 0x15b   : > { %v622_v39 = vcombine.low %v587_v13, %v595_v35  ;;  %v623_v63 = vcombine.high %v587_v13, %v595_v35 }
 0x15c   : > { %2063 = vrot.lane.b32.xlu1 %v4030_v37, %s3495_s8  ;;  %1721 = vrot.lane.b32.xlu0 %v4033_v38, %s3496_s17 }
 0x15d   : > { %v4051_v45 = vrot.slane %v622_v39, %v3675_v28  ;;  %v637_v8 = vrot.slane %v623_v63, %v3675_v28 }
 0x15e   : > { %v4053_v47 = vpop.permute.xlu1 %918  ;;  %v4055_v19 = vpop.permute.xlu0 %922 }
 0x15f   : > { %v639_v50 = vcombine.high %v4065_v59, %v4051_v45  ;;  %v1004_v18 = vcombine.low %v4027_v16, %v4055_v19  ;;  %v654_v24 = vcombine.low %v621_v17, %v637_v8  ;;  %v655_v54 = vcombine.high %v621_v17, %v637_v8 }
 0x160   : > { %2071 = vrot.lane.b32.xlu1 %v4047_v27, %s3494_s7  ;;  %2035 = vrot.lane.b32.xlu0 %v4058_v22, %s3495_s8 }
 0x161   : > { %v4101_v4 = vrot.slane %v639_v50, %v3805_v12  ;;  %v4126_v42 = vrot.slane %v1004_v18, %v3675_v28  ;;  %v4149_v6 = vrot.slane %v654_v24, %v3805_v12  ;;  %v4173_v17 = vrot.slane %v655_v54, %v3805_v12 }
 0x162   : > { %v4075_v2 = vpop.permute.xlu1 %926  ;;  %v4077_v3 = vpop.permute.xlu0 %912  ;;  %v4189_v24 = vrot.slane %v1596_v31, %v3805_v12  ;;  %v1629_v31 = vcombine.high %v3984_v5, %v4910_v0  ;;  %v1631_v5 = vcombine.high %v4033_v38, %v4910_v0 }
 0x163   : > { %v1020_v57 = vcombine.low %v4053_v47, %v4075_v2 }
 0x164   : > { %775 = vrot.lane.b32.xlu1 %v4080_v43, %s3495_s8  ;;  %2043 = vrot.lane.b32.xlu0 %v4072_v49, %s3494_s7  ;;  %v1628_v54 = vcombine.high %v4189_v24, %v4910_v0 }
 0x165   : > { %v4111_v26 = vrot.slane %v1020_v57, %v3675_v28 }
 0x166   : > { %v4096_v11 = vpop.permute.xlu1 %916  ;;  %v4098_v13 = vpop.permute.xlu0 %920 }
 0x167   : > { %v936_v30 = vcombine.low %v4077_v3, %v4098_v13  ;;  %v1037_v60 = vcombine.high %v4126_v42, %v4111_v26 }
 0x168   : > { %747 = vrot.lane.b32.xlu1 %v4101_v4, %s3495_s8  ;;  %2079 = vrot.lane.b32.xlu0 %v4091_v7, %s3496_s17 }
 0x169   : > { %v4152_v55 = vrot.slane %v936_v30, %v3675_v28  ;;  %v4170_v14 = vrot.slane %v1037_v60, %v3805_v12  ;;  %v1926_v60 = vcombine.low %v4015_v21, %v4003_v10  ;;  %v1630_v10 = vcombine.high %v4007_v15, %v4910_v0 }
 0x16a   : > { %v4113_v29 = vpop.permute.xlu1 %924  ;;  %v4115_v35 = vpop.permute.xlu0 %2500 }
 0x16b   : > { %v952_v39 = vcombine.low %v4096_v11, %v4113_v29 }
 0x16c   : > { %783 = vrot.lane.b32.xlu1 %v4118_v32, %s3494_s7  ;;  %2051 = vrot.lane.b32.xlu0 %v4121_v36, %s3496_s17 }
 0x16d   : > { %v4142_v61 = vrot.slane %v952_v39, %v3675_v28  ;;  %v1697_v39 = vcombine.high %v3963_v52, %v4910_v0  ;;  %v1698_v52 = vcombine.high %v3975_v62, %v4910_v0 }
 0x16e   : > { %v4144_v63 = vpop.permute.xlu1 %2504  ;;  %v4146_v50 = vpop.permute.xlu0 %2508 }
 0x16f   : > { %v969_v58 = vcombine.high %v4152_v55, %v4142_v61 }
 0x170   : > { %791 = vrot.lane.b32.xlu1 %v4137_v48, %s3496_s17  ;;  %755 = vrot.lane.b32.xlu0 %v4149_v6, %s3494_s7 }
 0x171   : > { %v4184_v18 = vrot.slane %v969_v58, %v3805_v12 }
 0x172   : > { %v4165_v8 = vpop.permute.xlu1 %2512  ;;  %v4167_v57 = vpop.permute.xlu0 %2498 }
 0x174   : > { %1105 = vrot.lane.b32.xlu1 %v4170_v14, %s3495_s8  ;;  %763 = vrot.lane.b32.xlu0 %v4173_v17, %s3496_s17 }
 0x176   : > { %v4179_v41 = vpop.permute.xlu1 %2502  ;;  %v4181_v46 = vpop.permute.xlu0 %2506 }
 0x178   : > { %1077 = vrot.lane.b32.xlu1 %v4184_v18, %s3495_s8  ;;  %1729 = vrot.lane.b32.xlu0 %v1696_v20, %s3497_s19 }
 0x17a   : > { %v4196_v30 = vpop.permute.xlu1 %2510  ;;  %v4198_v44 = vpop.permute.xlu0 %2830 }
 0x17c   : > { %1701 = vrot.lane.b32.xlu1 %v1628_v54, %s3497_s19  ;;  %1737 = vrot.lane.b32.xlu0 %v1697_v39, %s3498_s20  ;;  %v1994_v39 = vcombine.low %v3989_v56, %v3978_v1  ;;  %v4227_v54 = vrot.slane %v1926_v60, %v3805_v12  ;;  %v1699_v1 = vcombine.high %v4000_v9, %v4910_v0 }
 0x17d   : > { %v638_v56 = vcombine.low %v4065_v59, %v4051_v45  ;;  %v1959_v9 = vcombine.high %v4058_v22, %v4910_v0 }
 0x17e   : > { %v4210_v58 = vpop.permute.xlu1 %2834  ;;  %v4212_v20 = vpop.permute.xlu0 %2838  ;;  %v4242_v60 = vrot.slane %v1994_v39, %v3805_v12  ;;  %v2027_v39 = vcombine.high %v4030_v37, %v4910_v0  ;;  %v1961_v37 = vcombine.high %v4121_v36, %v4910_v0 }
 0x180   : > { %1709 = vrot.lane.b32.xlu1 %v1629_v31, %s3498_s20  ;;  %1745 = vrot.lane.b32.xlu0 %v1698_v52, %s3499_s22  ;;  %v1958_v31 = vcombine.high %v4227_v54, %v4910_v0  ;;  %v2026_v59 = vcombine.high %v4242_v60, %v4910_v0 }
 0x182   : > { %v4222_v21 = vpop.permute.xlu1 %2842  ;;  %v4224_v62 = vpop.permute.xlu0 %2828 }
 0x184   : > { %1717 = vrot.lane.b32.xlu1 %v1630_v10, %s3499_s22  ;;  %1725 = vrot.lane.b32.xlu0 %v1631_v5, %s3500_s26  ;;  %v4255_v10 = vrot.slane %v638_v56, %v3805_v12  ;;  %v706_v56 = vcombine.low %v4039_v40, %v4025_v34 }
 0x186   : > { %v4235_v15 = vpop.permute.xlu1 %2832  ;;  %v4237_v38 = vpop.permute.xlu0 %2836  ;;  %4925 = vst [vmem:[#allocation9_spill] sm:$0xff] %v4255_v10  ;;  %v670_v22 = vcombine.high %v4255_v10, %v4910_v0  ;;  %v4280_v40 = vrot.slane %v706_v56, %v3805_v12  ;;  %v2029_v56 = vcombine.high %v4091_v7, %v4910_v0  ;;  %v2590_v7 = vcombine.low %v4115_v35, %v4146_v50 }
 0x188   : > { %1753 = vrot.lane.b32.xlu1 %v1699_v1, %s3500_s26  ;;  %2031 = vrot.lane.b32.xlu0 %v1958_v31, %s3497_s19  ;;  %v2028_v31 = vcombine.high %v4047_v27, %v4910_v0  ;;  %v671_v27 = vcombine.high %v4101_v4, %v4910_v0  ;;  %v968_v4 = vcombine.low %v4152_v55, %v4142_v61 }
 0x18a   : > { %v4248_v52 = vpop.permute.xlu1 %2840  ;;  %v4250_v45 = vpop.permute.xlu0 %416 }
 0x18c   : > { %2059 = vrot.lane.b32.xlu1 %v2026_v59, %s3497_s19  ;;  %2039 = vrot.lane.b32.xlu0 %v1959_v9, %s3498_s20 }
 0x18e   : > { %v437_v5 = vpop.permute.xlu1 %436  ;;  %v4261_v1 = vpop.permute.xlu0 %424 }
 0x190   : > { %2067 = vrot.lane.b32.xlu1 %v2027_v39, %s3498_s20  ;;  %743 = vrot.lane.b32.xlu0 %v670_v22, %s3497_s19  ;;  %v739_v39 = vcombine.high %v4080_v43, %v4910_v0  ;;  %v1960_v22 = vcombine.high %v4072_v49, %v4910_v0  ;;  %v738_v43 = vcombine.high %v4280_v40, %v4910_v0 }
 0x192   : > { %v409_v9 = vpop.permute.xlu1 %408  ;;  %v405_v59 = vpop.permute.xlu0 %404 }
 0x193   : > { %v460_v49 = vsel %vm459_vm3, %v3814_v23, %v405_v59  ;;  %v673_v59 = vcombine.high %v4173_v17, %v4910_v0  ;;  %v2522_v17 = vcombine.low %v4167_v57, %v4181_v46 }
 0x194   : > { %2075 = vrot.lane.b32.xlu1 %v2028_v31, %s3499_s22  ;;  %2055 = vrot.lane.b32.xlu0 %v1961_v37, %s3500_s26  ;;  %v2606_v37 = vcombine.low %v4144_v63, %v4165_v8  ;;  %v462_v61 = vsel %vm461_vm4, %v460_v49, %v409_v9 }
 0x196   : > { %v445_v10 = vpop.permute.xlu1 %444  ;;  %v441_v34 = vpop.permute.xlu0 %440 }
 0x198   : > { %2047 = vrot.lane.b32.xlu1 %v1960_v22, %s3499_s22  ;;  %779 = vrot.lane.b32.xlu0 %v739_v39, %s3498_s20 }
 0x19a   : > { %v453_v36 = vpop.permute.xlu1 %452  ;;  %v413_v31 = vpop.permute.xlu0 %412 }
 0x19c   : > { %771 = vrot.lane.b32.xlu1 %v738_v43, %s3497_s19  ;;  %751 = vrot.lane.b32.xlu0 %v671_v27, %s3498_s20  ;;  %v672_v43 = vcombine.high %v4149_v6, %v4910_v0  ;;  %v740_v27 = vcombine.high %v4118_v32, %v4910_v0  ;;  %v1036_v6 = vcombine.low %v4126_v42, %v4111_v26 }
 0x19d   : > { %v464_v32 = vsel %vm463_vm5, %v462_v61, %v413_v31  ;;  %v4327_v42 = vrot.slane %v2590_v7, %v3675_v28 }
 0x19e   : > { %v433_v39 = vpop.permute.xlu1 %432  ;;  %v421_v22 = vpop.permute.xlu0 %420 }
 0x19f   : > { %v473_v23 = vsel %vm459_vm3, %v3835_v33, %v433_v39  ;;  %v4317_v39 = vrot.slane %v2606_v37, %v3675_v28  ;;  %v4341_v37 = vrot.slane %v1036_v6, %v3805_v12  ;;  %v266_v6 = vld [vmem:[%s4905_s1] sm:$0xff] }
 0x1a0   : > { %v474_v55 = vsel %vm461_vm4, %v473_v23, %v437_v5  ;;  %2083 = vrot.lane.b32.xlu1 %v2029_v56, %s3500_s26  ;;  %759 = vrot.lane.b32.xlu0 %v672_v43, %s3499_s22  ;;  %v2538_v5 = vcombine.low %v4179_v41, %v4196_v30  ;;  %v4323_v43 = vrot.slane %v968_v4, %v3805_v12 }
 0x1a1   : > { %v475_v33 = vsel %vm463_vm5, %v474_v55, %v441_v34  ;;  %v466_v34 = vsel %vm465_vm6, %v464_v32, %v4250_v45  ;;  %v741_v4 = vcombine.high %v4137_v48, %v4910_v0  ;;  %4927 = vst [vmem:[#allocation11_spill] sm:$0xff] %v4341_v37  ;;  %v2622_v23 = vcombine.low %v4327_v42, %v4317_v39 }
 0x1a2   : > { %v449_v9 = vpop.permute.xlu1 %448  ;;  %v476_v49 = vsel %vm465_vm6, %v475_v33, %v445_v10  ;;  %v429_v56 = vpop.permute.xlu0 %428  ;;  %4926 = vst [vmem:[#allocation10_spill] sm:$0xff] %v4323_v43  ;;  %v1021_v10 = vcombine.high %v4053_v47, %v4075_v2  ;;  %v468_v31 = vsel %vm467_vm7, %v466_v34, %v421_v22  ;;  %v2546_v45 = vrot.slane %v2538_v5, %v3675_v28 }
 0x1a3   : > { %v477_v26 = vsel %vm467_vm7, %v476_v49, %v449_v9  ;;  %v1000_v61 = vcombine.high %v4323_v43, %v4910_v0  ;;  %v1005_v2 = vcombine.high %v4027_v16, %v4055_v19  ;;  %v2530_v22 = vrot.slane %v2522_v17, %v3675_v28 }
 0x1a4   : > { %787 = vrot.lane.b32.xlu1 %v740_v27, %s3499_s22  ;;  %767 = vrot.lane.b32.xlu0 %v673_v59, %s3500_s26  ;;  %v478_v47 = vsel %vm469_vm8, %v477_v26, %v453_v36  ;;  %v470_v55 = vsel %vm469_vm8, %v468_v31, %v4261_v1  ;;  %v4363_v36 = vrot.slane %v1021_v10, %v3675_v28 }
 0x1a5   : > { %v953_v16 = vcombine.high %v4096_v11, %v4113_v29  ;;  %v472_v19 = vsel %vm471_vm9, %v470_v55, %v429_v56  ;;  %v1068_v32 = vcombine.high %v4341_v37, %v4910_v0  ;;  %v2554_v33 = vcombine.low %v2530_v22, %v2546_v45  ;;  %v3383_v37 = vld [vmem:[#allocation2 + $0xd] ss:$48 sps:$4 sm:$0xff]  }
 0x1a6   : > { %v457_v27 = vpop.permute.xlu1 %456  ;;  %v4346_v7 = vpop.permute.xlu0 %2329  ;;  %v1069_v5 = vcombine.high %v4170_v14, %v4910_v0  ;;  %v4379_v9 = vrot.slane %v2622_v23, %v3805_v12  ;;  %v1019_v11 = vrot.slane %v1005_v2, %v3675_v28  ;;  %v937_v29 = vcombine.high %v4077_v3, %v4098_v13 }
 0x1a7   : > { %v479_v48 = vsel %vm471_vm9, %v478_v47, %v457_v27  ;;  %v967_v14 = vrot.slane %v953_v16, %v3675_v28  ;;  %v1001_v3 = vcombine.high %v4184_v18, %v4910_v0  ;;  %v4399_v13 = vrot.slane %v2554_v33, %v3805_v12 }
 0x1a8   : > { %795 = vrot.lane.b32.xlu1 %v741_v4, %s3500_s26  ;;  %1073 = vrot.lane.b32.xlu0 %v1000_v61, %s3497_s19  ;;  %4928 = vst [vmem:[#allocation12_spill] sm:$0xff] %v4379_v9  ;;  %v1052_v49 = vcombine.low %v1019_v11, %v4363_v36  ;;  %v2654_v17 = vcombine.high %v4379_v9, %v4910_v0 }
 0x1a9   : > { %3236 = vmatprep.subr.msk.mxu1 %vm484_vm10, %v479_v48  ;;  %4929 = vst [vmem:[#allocation13_spill] sm:$0xff] %v4399_v13  ;;  %v951_v34 = vrot.slane %v937_v29, %v3675_v28  ;;  %v2623_v31 = vcombine.high %v4327_v42, %v4317_v39  ;;  %v2586_v18 = vcombine.high %v4399_v13, %v4910_v0 }
 0x1aa   : > { %3237 = vmatpush1.msk.msra.mxu1 %vm484_vm10, %v472_v19  ;;  %v4372_v1 = vpop.permute.xlu1 %2357  ;;  %v4374_v59 = vpop.permute.xlu0 %2333  ;;  %v1060_v27 = vrot.slane %v1052_v49, %v3805_v12  ;;  %v2555_v61 = vcombine.high %v2530_v22, %v2546_v45  ;;  %v2607_v48 = vcombine.high %v4144_v63, %v4165_v8  ;;  %v2591_v16 = vcombine.high %v4115_v35, %v4146_v50 }
 0x1ab   : > { %3238 = vmatmul.mubr.msk.f32.vlgmr.msra.gmra.mrb[0].mxu1 %vm480_vm11, %v266_v6  ;;  %v984_v10 = vcombine.low %v951_v34, %v967_v14  ;;  %v2637_v39 = vrot.slane %v2623_v31, %v3805_v12  ;;  %v1053_v19 = vcombine.high %v1019_v11, %v4363_v36  ;;  %v2539_v63 = vcombine.high %v4179_v41, %v4196_v30 }
 0x1ac   : > { %1101 = vrot.lane.b32.xlu1 %v1068_v32, %s3497_s19  ;;  %1109 = vrot.lane.b32.xlu0 %v1069_v5, %s3498_s20  ;;  %v1070_v45 = vcombine.high %v1060_v27, %v4910_v0  ;;  %v2569_v22 = vrot.slane %v2555_v61, %v3805_v12  ;;  %v2621_v32 = vrot.slane %v2607_v48, %v3675_v28 }
 0x1ad   : > { %885 = vmatprep.mubr.f32.mxu1 %v4910_v0  ;;  %v992_v42 = vrot.slane %v984_v10, %v3805_v12  ;;  %v2655_v5 = vcombine.high %v2637_v39, %v4910_v0  ;;  %v2605_v35 = vrot.slane %v2591_v16, %v3675_v28  ;;  %v2523_v50 = vcombine.high %v4167_v57, %v4181_v46  ;;  %v3377_v57 = vld [vmem:[#allocation2 + $0x21] ss:$48 sps:$4 sm:$0xff]   ;;  %v3381_v16 = vld [vmem:[#allocation2 + $0x19] ss:$48 sps:$4 sm:$0xff]  }
 0x1ae   : > { %v4390_v56 = vpop.permute.xlu1 %2361  ;;  %v4392_v26 = vpop.permute.xlu0 %2337  ;;  %v1067_v36 = vrot.slane %v1053_v19, %v3805_v12  ;;  %v985_v41 = vcombine.high %v951_v34, %v967_v14  ;;  %v2553_v11 = vrot.slane %v2539_v63, %v3675_v28  ;;  %v1326_v61 = vrot.slane %v3377_v57, %v3675_v28 }
 0x1af   : > { %v1002_v29 = vcombine.high %v992_v42, %v4910_v0  ;;  %v2638_v30 = vcombine.low %v2605_v35, %v2621_v32  ;;  %v2537_v10 = vrot.slane %v2523_v50, %v3675_v28 }
 0x1b0   : > { %2687 = vrot.lane.b32.xlu1 %v2654_v17, %s3497_s19  ;;  %1081 = vrot.lane.b32.xlu0 %v1001_v3, %s3498_s20  ;;  %v2587_v3 = vcombine.high %v2569_v22, %v4910_v0 }
 0x1b1   : > { %v2570_v46 = vcombine.low %v2537_v10, %v2553_v11  ;;  %v2646_v34 = vrot.slane %v2638_v30, %v3805_v12 }
 0x1b2   : > { %v4406_v4 = vpop.permute.xlu1 %2365  ;;  %v4408_v23 = vpop.permute.xlu0 %2341 }
 0x1b3   : > { %v2656_v30 = vcombine.high %v2646_v34, %v4910_v0 }
 0x1b4   : > { %1113 = vrot.lane.b32.xlu1 %v1060_v27, %s3494_s7  ;;  %2659 = vrot.lane.b32.xlu0 %v2586_v18, %s3497_s19  ;;  %v999_v27 = vrot.slane %v985_v41, %v3805_v12  ;;  %v3375_v18 = vld [vmem:[#allocation2 + $0x9] ss:$48 sps:$4 sm:$0xff]  }
 0x1b5   : > { %v1310_v19 = vrot.slane %v3375_v18, %v3675_v28 }
 0x1b6   : > { %v4415_v47 = vpop.permute.xlu1 %2369  ;;  %v4417_v2 = vpop.permute.xlu0 %2377 }
 0x1b7   : > { %v1334_v63 = vcombine.low %v1310_v19, %v1326_v61 }
 0x1b8   : > { %2691 = vrot.lane.b32.xlu1 %v2637_v39, %s3495_s8  ;;  %1085 = vrot.lane.b32.xlu0 %v992_v42, %s3494_s7  ;;  %v3379_v39 = vld [vmem:[#allocation2 + $0x1] ss:$48 sps:$4 sm:$0xff]  }
 0x1b9   : > { %v4489_v57 = vrot.slane %v1334_v63, %v3805_v12  ;;  %v2920_v63 = vcombine.low %v4198_v44, %v4212_v20 }
 0x1ba   : > { %v4425_v55 = vpop.permute.xlu1 %2373  ;;  %v4427_v6 = vpop.permute.xlu0 %2349 }
 0x1bb   : > { %4932 = vst [vmem:[#allocation16_spill] sm:$0xff] %v4489_v57  ;;  %v2928_v13 = vrot.slane %v2920_v63, %v3675_v28 }
 0x1bc   : > { %1117 = vrot.lane.b32.xlu1 %v1070_v45, %s3499_s22  ;;  %2663 = vrot.lane.b32.xlu0 %v2569_v22, %s3495_s8  ;;  %v1071_v45 = vcombine.high %v1067_v36, %v4910_v0  ;;  %v2578_v22 = vrot.slane %v2570_v46, %v3805_v12  ;;  %v2571_v46 = vcombine.high %v2537_v10, %v2553_v11 }
 0x1bd   : > { %v1366_v11 = vcombine.high %v4489_v57, %v4910_v0 }
 0x1be   : > { %v4439_v8 = vpop.permute.xlu1 %2345  ;;  %v4441_v33 = vpop.permute.xlu0 %2353  ;;  %v2585_v10 = vrot.slane %v2571_v46, %v3805_v12  ;;  %v4934_v46 = vmov 0.0  }
 0x1bf   : > { %4930 = vst [vmem:[#allocation14_spill] sm:$0xff] %v4441_v33 }
 0x1c0   : > { %2695 = vrot.lane.b32.xlu1 %v2655_v5, %s3498_s20  ;;  %1089 = vrot.lane.b32.xlu0 %v1002_v29, %s3499_s22  ;;  %v1242_v5 = vrot.slane %v3379_v39, %v3675_v28  ;;  %v2639_v29 = vcombine.high %v2605_v35, %v2621_v32  ;;  %v2588_v35 = vcombine.high %v2578_v22, %v4910_v0 }
 0x1c2   : > { %v4452_v49 = vpop.permute.xlu1 %2381  ;;  %v4454_v17 = vpop.permute.xlu0 %1733 }
 0x1c3   : > { %4931 = vst [vmem:[#allocation15_spill] sm:$0xff] %v4452_v49 }
 0x1c4   : > { %1121 = vrot.lane.b32.xlu1 %v1067_v36, %s3496_s17  ;;  %2667 = vrot.lane.b32.xlu0 %v2587_v3, %s3498_s20  ;;  %v1003_v36 = vcombine.high %v999_v27, %v4910_v0  ;;  %v1258_v3 = vrot.slane %v3381_v16, %v3675_v28 }
 0x1c6   : > { %v4460_v31 = vpop.permute.xlu1 %1705  ;;  %v4462_v14 = vpop.permute.xlu0 %1741  ;;  %v1266_v39 = vcombine.low %v1242_v5, %v1258_v3  ;;  %v1267_v63 = vcombine.high %v1242_v5, %v1258_v3 }
 0x1c8   : > { %2699 = vrot.lane.b32.xlu1 %v2646_v34, %s3494_s7  ;;  %1093 = vrot.lane.b32.xlu0 %v999_v27, %s3496_s17  ;;  %v2653_v34 = vrot.slane %v2639_v29, %v3805_v12  ;;  %v2936_v27 = vcombine.low %v4210_v58, %v4222_v21  ;;  %v1335_v29 = vcombine.high %v1310_v19, %v1326_v61  ;;  %v3384_v19 = vld [vmem:[#allocation2 + $0x25] ss:$48 sps:$4 sm:$0xff]  }
 0x1c9   : > { %v1281_v49 = vrot.slane %v1267_v63, %v3805_v12 }
 0x1ca   : > { %v4469_v42 = vpop.permute.xlu1 %1713  ;;  %v4471_v48 = vpop.permute.xlu0 %1749  ;;  %v1349_v61 = vrot.slane %v1335_v29, %v3805_v12  ;;  %v3385_v29 = vld [vmem:[#allocation2 + $0x5] ss:$48 sps:$4 sm:$0xff]  }
 0x1cc   : > { %1125 = vrot.lane.b32.xlu1 %v1071_v45, %s3500_s26  ;;  %2671 = vrot.lane.b32.xlu0 %v2578_v22, %s3494_s7  ;;  %v4509_v22 = vrot.slane %v1266_v39, %v3805_v12  ;;  %v2657_v39 = vcombine.high %v2653_v34, %v4934_v46  ;;  %v1367_v5 = vcombine.high %v1349_v61, %v4934_v46 }
 0x1ce   : > { %v4479_v50 = vpop.permute.xlu1 %2063  ;;  %v4481_v41 = vpop.permute.xlu0 %1721  ;;  %4933 = vst [vmem:[#allocation17_spill] sm:$0xff] %v4509_v22  ;;  %v1298_v57 = vcombine.high %v4509_v22, %v4934_v46  ;;  %v2589_v22 = vcombine.high %v2585_v10, %v4934_v46 }
 0x1d0   : > { %2703 = vrot.lane.b32.xlu1 %v2656_v30, %s3499_s22  ;;  %1097 = vrot.lane.b32.xlu0 %v1003_v36, %s3500_s26  ;;  %v2944_v30 = vrot.slane %v2936_v27, %v3675_v28  ;;  %v2868_v36 = vcombine.low %v4235_v15, %v4248_v52 }
 0x1d2   : > { %v4491_v18 = vpop.permute.xlu1 %2071  ;;  %v4493_v32 = vpop.permute.xlu0 %2035  ;;  %v2952_v27 = vcombine.low %v2928_v13, %v2944_v30  ;;  %v2876_v9 = vrot.slane %v2868_v36, %v3675_v28 }
 0x1d4   : > { %2675 = vrot.lane.b32.xlu1 %v2588_v35, %s3499_s22  ;;  %2707 = vrot.lane.b32.xlu0 %v2653_v34, %s3496_s17  ;;  %v4550_v3 = vrot.slane %v2952_v27, %v3805_v12  ;;  %v1299_v27 = vcombine.high %v1281_v49, %v4934_v46 }
 0x1d6   : > { %v4501_v45 = vpop.permute.xlu1 %775  ;;  %v4503_v16 = vpop.permute.xlu0 %2043  ;;  %4938 = vst [vmem:[#allocation21_spill] sm:$0xff] %v4550_v3 }
 0x1d8   : > { %1399 = vrot.lane.b32.xlu1 %v1366_v11, %s3497_s19  ;;  %2679 = vrot.lane.b32.xlu0 %v2585_v10, %s3496_s17  ;;  %v2852_v11 = vcombine.low %v4224_v62, %v4237_v38  ;;  %v3386_v10 = vld [vmem:[#allocation2 + $0x1d] ss:$48 sps:$4 sm:$0xff]  }
 0x1da   : > { %v4518_v35 = vpop.permute.xlu1 %747  ;;  %v4520_v0 = vpop.permute.xlu0 %2079  ;;  %v2860_v33 = vrot.slane %v2852_v11, %v3675_v28  ;;  %v1317_v11 = vrot.slane %v3383_v37, %v3675_v28 }
 0x1dc   : > { %2711 = vrot.lane.b32.xlu1 %v2657_v39, %s3500_s26  ;;  %1371 = vrot.lane.b32.xlu0 %v1298_v57, %s3497_s19  ;;  %v4541_v57 = vrot.slane %v3384_v19, %v3675_v28  ;;  %v2884_v39 = vcombine.low %v2860_v33, %v2876_v9  ;;  %v4557_v19 = vrot.slane %v3385_v29, %v3675_v28 }
 0x1dd   : > { %v2953_v29 = vcombine.high %v2928_v13, %v2944_v30 }
 0x1de   : > { %v4532_v43 = vpop.permute.xlu1 %783  ;;  %v4534_v34 = vpop.permute.xlu0 %2051  ;;  %v4567_v37 = vrot.slane %v2884_v39, %v3805_v12  ;;  %v2885_v39 = vcombine.high %v2860_v33, %v2876_v9 }
 0x1df   : > { %4935 = vst [vmem:[#allocation18_spill] sm:$0xff] %v4532_v43  ;;  %v2967_v13 = vrot.slane %v2953_v29, %v3805_v12 }
 0x1e0   : > { %1403 = vrot.lane.b32.xlu1 %v1349_v61, %s3495_s8  ;;  %2683 = vrot.lane.b32.xlu0 %v2589_v22, %s3500_s26  ;;  %v1350_v22 = vcombine.low %v1317_v11, %v4541_v57  ;;  %v2984_v61 = vcombine.high %v4550_v3, %v4934_v46  ;;  %4941 = vst [vmem:[#allocation24_spill] sm:$0xff] %v4567_v37 }
 0x1e1   : > { %v2916_v3 = vcombine.high %v4567_v37, %v4934_v46 }
 0x1e2   : > { %v4543_v36 = vpop.permute.xlu1 %791  ;;  %v4545_v43 = vpop.permute.xlu0 %755 }
 0x1e3   : > { %4936 = vst [vmem:[#allocation19_spill] sm:$0xff] %v4543_v36  ;;  %4937 = vst [vmem:[#allocation20_spill] sm:$0xff] %v4545_v43  ;;  %v4570_v43 = vrot.slane %v3386_v10, %v3675_v28 }
 0x1e4   : > { %1375 = vrot.lane.b32.xlu1 %v1281_v49, %s3495_s8  ;;  %1407 = vrot.lane.b32.xlu0 %v1367_v5, %s3498_s20 }
 0x1e5   : > { %v1282_v49 = vcombine.low %v4557_v19, %v4570_v43 }
 0x1e6   : > { %v4559_v36 = vpop.permute.xlu1 %1105  ;;  %v4561_v63 = vpop.permute.xlu0 %763 }
 0x1e7   : > { %4939 = vst [vmem:[#allocation22_spill] sm:$0xff] %v4559_v36  ;;  %4940 = vst [vmem:[#allocation23_spill] sm:$0xff] %v4561_v63  ;;  %v1358_v63 = vrot.slane %v1350_v22, %v3805_v12  ;;  %v1290_v30 = vrot.slane %v1282_v49, %v3805_v12 }
 0x1e8   : > { %3017 = vrot.lane.b32.xlu1 %v2984_v61, %s3497_s19  ;;  %1379 = vrot.lane.b32.xlu0 %v1299_v27, %s3498_s20 }
 0x1ea   : > { %v4574_v5 = vpop.permute.xlu1 %1077  ;;  %v1730_v36 = vpop.permute.xlu0 %1729 }
 0x1eb   : > { %v1763_v22 = vsel %vm459_vm3, %v4159_v25, %v1730_v36  ;;  %v1368_v25 = vcombine.high %v1358_v63, %v4934_v46  ;;  %v2899_v36 = vrot.slane %v2885_v39, %v3805_v12 }
 0x1ec   : > { %1411 = vrot.lane.b32.xlu1 %v1358_v63, %s3494_s7  ;;  %2989 = vrot.lane.b32.xlu0 %v2916_v3, %s3497_s19  ;;  %v2937_v3 = vcombine.high %v4210_v58, %v4222_v21  ;;  %v1764_v9 = vsel %vm461_vm4, %v1763_v22, %v4454_v17  ;;  %v1300_v21 = vcombine.high %v1290_v30, %v4934_v46 }
 0x1ed   : > { %v1351_v17 = vcombine.high %v1317_v11, %v4541_v57  ;;  %v2853_v57 = vcombine.high %v4224_v62, %v4237_v38 }
 0x1ee   : > { %v1702_v10 = vpop.permute.xlu1 %1701  ;;  %v1738_v61 = vpop.permute.xlu0 %1737  ;;  %v2951_v58 = vrot.slane %v2937_v3, %v3675_v28 }
 0x1ef   : > { %v1756_v27 = vsel %vm459_vm3, %v4189_v24, %v1702_v10  ;;  %v2921_v24 = vcombine.high %v4198_v44, %v4212_v20  ;;  %v1765_v10 = vsel %vm463_vm5, %v1764_v9, %v1738_v61  ;;  %v2985_v61 = vcombine.high %v2967_v13, %v4934_v46 }
 0x1f0   : > { %3021 = vrot.lane.b32.xlu1 %v2967_v13, %s3495_s8  ;;  %1383 = vrot.lane.b32.xlu0 %v1290_v30, %s3494_s7  ;;  %v1757_v33 = vsel %vm461_vm4, %v1756_v27, %v4460_v31  ;;  %v2869_v31 = vcombine.high %v4235_v15, %v4248_v52  ;;  %v1766_v44 = vsel %vm465_vm6, %v1765_v10, %v4462_v14 }
 0x1f1   : > { %v2935_v22 = vrot.slane %v2921_v24, %v3675_v28  ;;  %v1365_v52 = vrot.slane %v1351_v17, %v3805_v12  ;;  %v1283_v14 = vcombine.high %v4557_v19, %v4570_v43  ;;  %v2917_v13 = vcombine.high %v2899_v36, %v4934_v46  ;;  %v3251_v43 = vld [vmem:[%s4905_s1 + $0x20] sm:$0xff] }
 0x1f2   : > { %v1710_v29 = vpop.permute.xlu1 %1709  ;;  %v1746_v49 = vpop.permute.xlu0 %1745  ;;  %v2867_v9 = vrot.slane %v2853_v57, %v3675_v28 }
 0x1f3   : > { %v1758_v37 = vsel %vm463_vm5, %v1757_v33, %v1710_v29  ;;  %v1767_v27 = vsel %vm467_vm7, %v1766_v44, %v1746_v49  ;;  %v2968_v15 = vcombine.low %v2935_v22, %v2951_v58  ;;  %v2969_v10 = vcombine.high %v2935_v22, %v2951_v58 }
 0x1f4   : > { %1415 = vrot.lane.b32.xlu1 %v1368_v25, %s3499_s22  ;;  %2993 = vrot.lane.b32.xlu0 %v2899_v36, %s3495_s8  ;;  %v1759_v20 = vsel %vm465_vm6, %v1758_v37, %v4469_v42  ;;  %v2883_v42 = vrot.slane %v2869_v31, %v3675_v28  ;;  %v1768_v3 = vsel %vm469_vm8, %v1767_v27, %v4471_v48  ;;  %s3502_s8 = smov [#allocation6]  }
 0x1f5   : > { %v2976_v29 = vrot.slane %v2968_v15, %v3805_v12  ;;  %v1297_v28 = vrot.slane %v1283_v14, %v3805_v12  ;;  %v1369_v36 = vcombine.high %v1365_v52, %v4934_v46  ;;  %v2983_v58 = vrot.slane %v2969_v10, %v3805_v12 }
 0x1f6   : > { %v1718_v63 = vpop.permute.xlu1 %1717  ;;  %v1726_v39 = vpop.permute.xlu0 %1725  ;;  %v2900_v48 = vcombine.low %v2867_v9, %v2883_v42 }
 0x1f7   : > { %v1760_v30 = vsel %vm467_vm7, %v1759_v20, %v1718_v63  ;;  %v2986_v44 = vcombine.high %v2976_v29, %v4934_v46  ;;  %v1301_v20 = vcombine.high %v1297_v28, %v4934_v46 }
 0x1f8   : > { %3025 = vrot.lane.b32.xlu1 %v2985_v61, %s3498_s20  ;;  %1387 = vrot.lane.b32.xlu0 %v1300_v21, %s3499_s22  ;;  %v1761_v62 = vsel %vm469_vm8, %v1760_v30, %v4481_v41  ;;  %v2908_v24 = vrot.slane %v2900_v48, %v3805_v12 }
 0x1f9   : > { %v1762_v19 = vsel %vm471_vm9, %v1761_v62, %v1726_v39  ;;  %v2901_v39 = vcombine.high %v2867_v9, %v2883_v42 }
 0x1fa   : > { %v1754_v11 = vpop.permute.xlu1 %1753  ;;  %v2032_v37 = vpop.permute.xlu0 %2031  ;;  %v2918_v57 = vcombine.high %v2908_v24, %v4934_v46 }
 0x1fb   : > { %v1769_v38 = vsel %vm471_vm9, %v1768_v3, %v1754_v11  ;;  %v2086_v21 = vsel %vm459_vm3, %v4227_v54, %v2032_v37  ;;  %v4942_v3 = vld [vmem:[#allocation9_spill] sm:$0xff] }
 0x1fc   : > { %1419 = vrot.lane.b32.xlu1 %v1365_v52, %s3496_s17  ;;  %2997 = vrot.lane.b32.xlu0 %v2917_v13, %s3498_s20  ;;  %v2087_v61 = vsel %vm461_vm4, %v2086_v21, %v4493_v32  ;;  %v2384_v52 = vsel %vm459_vm3, %v3864_v51, %v4346_v7  ;;  %v2391_v32 = vsel %vm459_vm3, %v3870_v53, %v4372_v1 }
 0x1fd   : > { %3252 = vmatprep.subr.msk.mxu0 %vm484_vm10, %v1769_v38  ;;  %v2385_v14 = vsel %vm461_vm4, %v2384_v52, %v4374_v59  ;;  %v2392_v42 = vsel %vm461_vm4, %v2391_v32, %v4390_v56  ;;  %v2915_v51 = vrot.slane %v2901_v39, %v3805_v12 }
 0x1fe   : > { %3253 = vmatpush1.msk.msra.mxu0 %vm484_vm10, %v1762_v19  ;;  %v2060_v41 = vpop.permute.xlu1 %2059  ;;  %v2040_v33 = vpop.permute.xlu0 %2039  ;;  %v2386_v53 = vsel %vm463_vm5, %v2385_v14, %v4392_v26  ;;  %v2393_v7 = vsel %vm463_vm5, %v2392_v42, %v4406_v4 }
 0x1ff   : > { %3254 = vmatmul.mubr.msk.f32.vlgmr.msra.gmra.mrb[0].mxu0 %vm480_vm11, %v3251_v43  ;;  %v2093_v63 = vsel %vm459_vm3, %v4242_v60, %v2060_v41  ;;  %v2088_v54 = vsel %vm463_vm5, %v2087_v61, %v2040_v33  ;;  %v3501_v60 = vmov 0   ;;  %v2387_v56 = vsel %vm465_vm6, %v2386_v53, %v4408_v23 }
 0x200   : > { %3029 = vrot.lane.b32.xlu1 %v2976_v29, %s3494_s7  ;;  %1391 = vrot.lane.b32.xlu0 %v1297_v28, %s3496_s17  ;;  %v2094_v22 = vsel %vm461_vm4, %v2093_v63, %v4479_v50  ;;  %v2987_v50 = vcombine.high %v2983_v58, %v4934_v46  ;;  %v2089_v11 = vsel %vm465_vm6, %v2088_v54, %v4503_v16  ;;  %v4944_v29 = vld [vmem:[#allocation14_spill] sm:$0xff] }
 0x201   : > { %2173 = vmatprep.mubr.f32.mxu0 %v4934_v46  ;;  %3358 = vset.pattern.permute.xlu0 %v3501_v60  ;;  %v2394_v16 = vsel %vm465_vm6, %v2393_v7, %v4415_v47  ;;  %v2388_v4 = vsel %vm467_vm7, %v2387_v56, %v4439_v8  ;;  %v2919_v9 = vcombine.high %v2915_v51, %v4934_v46  ;;  %v3239_v54 = vld [vmem:[%s4905_s1 + $0x8] sm:$0xff]  ;;  %v4949_v7 = vld [vmem:[#allocation11_spill] sm:$0xff] }
 0x202   : > { %v2068_v49 = vpop.permute.xlu1 %2067  ;;  %v744_v25 = vpop.permute.xlu0 %743  ;;  %v2395_v23 = vsel %vm467_vm7, %v2394_v16, %v4425_v55  ;;  %v2389_v43 = vsel %vm469_vm8, %v2388_v4, %v4427_v6 }
 0x203   : > { %v2095_v15 = vsel %vm463_vm5, %v2094_v22, %v2068_v49  ;;  %v2396_v48 = vsel %vm469_vm8, %v2395_v23, %v4417_v2  ;;  %v2390_v28 = vsel %vm471_vm9, %v2389_v43, %v4944_v29  ;;  %v3259_v22 = vld [vmem:[%s4905_s1 + $0x30] sm:$0xff] }
 0x204   : > { %1423 = vrot.lane.b32.xlu1 %v1369_v36, %s3500_s26  ;;  %3001 = vrot.lane.b32.xlu0 %v2908_v24, %s3494_s7  ;;  %v2096_v1 = vsel %vm465_vm6, %v2095_v15, %v4491_v18  ;;  %v798_v18 = vsel %vm459_vm3, %v4942_v3, %v744_v25  ;;  %v4945_v25 = vld [vmem:[#allocation18_spill] sm:$0xff]  ;;  %v4946_v24 = vld [vmem:[#allocation20_spill] sm:$0xff]  ;;  %s3417_s7 = scalar_lea.vmem %s4862_s11, 256 }
 0x205   : > { %v799_v55 = vsel %vm461_vm4, %v798_v18, %v4518_v35  ;;  %v4943_v35 = vld [vmem:[#allocation15_spill] sm:$0xff]  ;;  %p3418_p6 = scmp.ne.s32.totalorder %s4862_s11, %s3417_s7 }
 0x206   : > { %v2076_v17 = vpop.permute.xlu1 %2075  ;;  %v2056_v31 = vpop.permute.xlu0 %2055  ;;  %v2397_v33 = vsel %vm471_vm9, %v2396_v48, %v4943_v35 }
 0x207   : > { %v2097_v12 = vsel %vm467_vm7, %v2096_v1, %v2076_v17  ;;  %p3419_p12 = pnand %p3418_p6, %p4958_p11 }
 0x208   : > { %3033 = vrot.lane.b32.xlu1 %v2986_v44, %s3499_s22  ;;  %1395 = vrot.lane.b32.xlu0 %v1301_v20, %s3500_s26  ;;  %v2098_v8 = vsel %vm469_vm8, %v2097_v12, %v4520_v0  ;;  %v3255_v0 = vld [vmem:[%s4905_s1 + $0x28] sm:$0xff]  ;;  %v4947_v44 = vld [vmem:[#allocation19_spill] sm:$0xff] }
 0x209   : > { %p3420_p13 = pneg %p3419_p12 }
 0x20a   : > { %v2048_v27 = vpop.permute.xlu1 %2047  ;;  %v780_v30 = vpop.permute.xlu0 %779 }
 0x20b   : > { %v2090_v37 = vsel %vm467_vm7, %v2089_v11, %v2048_v27 }
 0x20c   : > { %3005 = vrot.lane.b32.xlu1 %v2918_v57, %s3499_s22  ;;  %3037 = vrot.lane.b32.xlu0 %v2983_v58, %s3496_s17  ;;  %v2091_v47 = vsel %vm469_vm8, %v2090_v37, %v4534_v34  ;;  %v4948_v58 = vld [vmem:[#allocation23_spill] sm:$0xff] }
 0x20d   : > { %v2092_v6 = vsel %vm471_vm9, %v2091_v47, %v2056_v31 }
 0x20e   : > { %v772_v59 = vpop.permute.xlu1 %771  ;;  %v752_v13 = vpop.permute.xlu0 %751 }
 0x20f   : > { %v805_v26 = vsel %vm459_vm3, %v4280_v40, %v772_v59  ;;  %v800_v41 = vsel %vm463_vm5, %v799_v55, %v752_v13  ;;  %v4950_v13 = vld [vmem:[#allocation22_spill] sm:$0xff] }
 0x210   : > { %v806_v62 = vsel %vm461_vm4, %v805_v26, %v4501_v45  ;;  %3009 = vrot.lane.b32.xlu1 %v2915_v51, %s3496_s17  ;;  %3041 = vrot.lane.b32.xlu0 %v2987_v50, %s3500_s26  ;;  %v252_v45 = vld [vmem:[%s4906_s2] sm:$0xff]  ;;  %v801_v10 = vsel %vm465_vm6, %v800_v41, %v4946_v24  ;;  %v4951_v26 = vld [vmem:[#allocation10_spill] sm:$0xff]  ;;  %s3421_s17 = sshll.u32 %s3502_s8, 4  ;;  %s3422_s17 = int_to_ptr.vmem [resolvable:$false] %s3421_s17 }
 0x211   : > { %v807_v34 = vsel %vm463_vm5, %v806_v62, %v780_v30  ;;  %s3423_s19 = scalar_lea.vmem %s3422_s17, 512  ;;  %p3424_p8 = scmp.lt.s32.totalorder %s4862_s11, %s3422_s17 }
 0x212   : > { %v2084_v40 = vpop.permute.xlu1 %2083  ;;  %v760_v38 = vpop.permute.xlu0 %759  ;;  %v808_v2 = vsel %vm465_vm6, %v807_v34, %v4945_v25  ;;  %p3425_p10 = scmp.lt.s32.totalorder %s3423_s19, %s3417_s7 }
 0x213   : > { %v2099_v19 = vsel %vm471_vm9, %v2098_v8, %v2084_v40  ;;  %v802_v17 = vsel %vm467_vm7, %v801_v10, %v760_v38 }
 0x214   : > { %3013 = vrot.lane.b32.xlu1 %v2919_v9, %s3500_s26  ;;  %3256 = vmatprep.subr.msk.mxu0 %vm484_vm10, %v2099_v19  ;;  %v803_v39 = vsel %vm469_vm8, %v802_v17, %v4948_v58  ;;  %p3426_p0 = por %p3425_p10, %p3424_p8 }
 0x215   : > { %3257 = vmatpush1.msk.msra.mxu0 %vm484_vm10, %v2092_v6  ;;  %255 = vperm.xlu0 %3358, %v252_v45   ;;  %v4952_v6 = vld [vmem:[#allocation12_spill] sm:$0xff] }
 0x216   : > { %v788_v49 = vpop.permute.xlu1 %787  ;;  %3260 = vmatprep.subr.msk.mxu0 %vm484_vm10, %v2397_v33  ;;  %v768_v36 = vpop.permute.xlu0 %767  ;;  %3258 = vmatmul.mubr.msk.f32.vlgmr.msra.gmra.mrb[0].mxu0 %vm480_vm11, %v3255_v0  ;;  %p3427_p2 = pnand %p3426_p0, %p3420_p13 }
 0x217   : > { %v809_v21 = vsel %vm467_vm7, %v808_v2, %v788_v49  ;;  %3261 = vmatpush1.msk.msra.mxu0 %vm484_vm10, %v2390_v28  ;;  %2471 = vmatprep.mubr.f32.mxu0 %v4934_v46  ;;  %v804_v27 = vsel %vm471_vm9, %v803_v39, %v768_v36  ;;  %v4953_v2 = vld [vmem:[#allocation13_spill] sm:$0xff] }
 0x218   : > { %v810_v20 = vsel %vm469_vm8, %v809_v21, %v4947_v44 }
 0x21a   : > { %v796_v31 = vpop.permute.xlu1 %795  ;;  %v1074_v63 = vpop.permute.xlu0 %1073 }
 0x21b   : > { %v811_v61 = vsel %vm471_vm9, %v810_v20, %v796_v31  ;;  %v1128_v4 = vsel %vm459_vm3, %v4951_v26, %v1074_v63  ;;  %v4955_v26 = vld [vmem:[#allocation17_spill] sm:$0xff] }
 0x21c   : > { %3240 = vmatprep.subr.msk.mxu1 %vm484_vm10, %v811_v61  ;;  %v1129_v23 = vsel %vm461_vm4, %v1128_v4, %v4574_v5  ;;  %v3243_v5 = vld [vmem:[%s4905_s1 + $0x10] sm:$0xff] }
 0x21d   : > { %3241 = vmatpush1.msk.msra.mxu1 %vm484_vm10, %v804_v27 }
 0x21e   : > { %v1102_v30 = vpop.permute.xlu1 %1101  ;;  %v1110_v57 = vpop.permute.xlu0 %1109  ;;  %3242 = vmatmul.mubr.msk.f32.vlgmr.msra.gmra.mrb[0].mxu1 %vm480_vm11, %v3239_v54  ;;  %3262 = vmatmul.mubr.msk.f32.vlgmr.msra.gmra.mrb[0].mxu0 %vm480_vm11, %v3259_v22  ;;  %v3263_v22 = vld [vmem:[%s4905_s1 + $0x38] sm:$0xff] }
 0x21f   : > { %1215 = vmatprep.mubr.f32.mxu1 %v4934_v46  ;;  %2801 = vmatprep.mubr.f32.mxu0 %v4934_v46  ;;  %v1135_v1 = vsel %vm459_vm3, %v4949_v7, %v1102_v30 }
 0x220   : > { %v1136_v56 = vsel %vm461_vm4, %v1135_v1, %v4950_v13 }
 0x221   : > { %v1137_v3 = vsel %vm463_vm5, %v1136_v56, %v1110_v57 }
 0x222   : > { %v2688_v60 = vpop.permute.xlu1 %2687  ;;  %v1082_v15 = vpop.permute.xlu0 %1081 }
 0x223   : > { %v1130_v38 = vsel %vm463_vm5, %v1129_v23, %v1082_v15  ;;  %v2721_v35 = vsel %vm459_vm3, %v4952_v6, %v2688_v60 }
 0x226   : > { %v1114_v52 = vpop.permute.xlu1 %1113  ;;  %v2660_v32 = vpop.permute.xlu0 %2659 }
 0x227   : > { %v1138_v18 = vsel %vm465_vm6, %v1137_v3, %v1114_v52  ;;  %v2714_v36 = vsel %vm459_vm3, %v4953_v2, %v2660_v32 }
 0x22a   : > { %v2692_v50 = vpop.permute.xlu1 %2691  ;;  %v1086_v14 = vpop.permute.xlu0 %1085 }
 0x22b   : > { %v1131_v45 = vsel %vm465_vm6, %v1130_v38, %v1086_v14  ;;  %v2722_v33 = vsel %vm461_vm4, %v2721_v35, %v2692_v50 }
 0x22e   : > { %v1118_v42 = vpop.permute.xlu1 %1117  ;;  %v2664_v11 = vpop.permute.xlu0 %2663 }
 0x22f   : > { %v1139_v62 = vsel %vm467_vm7, %v1138_v18, %v1118_v42  ;;  %v2715_v10 = vsel %vm461_vm4, %v2714_v36, %v2664_v11 }
 0x232   : > { %v2696_v51 = vpop.permute.xlu1 %2695  ;;  %v1090_v53 = vpop.permute.xlu0 %1089 }
 0x233   : > { %v1132_v43 = vsel %vm467_vm7, %v1131_v45, %v1090_v53  ;;  %v2723_v49 = vsel %vm463_vm5, %v2722_v33, %v2696_v51 }
 0x236   : > { %v1122_v37 = vpop.permute.xlu1 %1121  ;;  %v2668_v59 = vpop.permute.xlu0 %2667 }
 0x237   : > { %v1140_v47 = vsel %vm469_vm8, %v1139_v62, %v1122_v37  ;;  %v2716_v44 = vsel %vm463_vm5, %v2715_v10, %v2668_v59  ;;  %v4954_v37 = vld [vmem:[#allocation16_spill] sm:$0xff] }
 0x23a   : > { %v2700_v16 = vpop.permute.xlu1 %2699  ;;  %v1094_v12 = vpop.permute.xlu0 %1093 }
 0x23b   : > { %v1133_v55 = vsel %vm469_vm8, %v1132_v43, %v1094_v12  ;;  %v2724_v25 = vsel %vm465_vm6, %v2723_v49, %v2700_v16 }
 0x23e   : > { %v1126_v40 = vpop.permute.xlu1 %1125  ;;  %v2672_v8 = vpop.permute.xlu0 %2671 }
 0x23f   : > { %v1141_v9 = vsel %vm471_vm9, %v1140_v47, %v1126_v40  ;;  %v2717_v63 = vsel %vm465_vm6, %v2716_v44, %v2672_v8 }
 0x240   : > { %3244 = vmatprep.subr.msk.mxu1 %vm484_vm10, %v1141_v9 }
 0x242   : > { %v2704_v19 = vpop.permute.xlu1 %2703  ;;  %v1098_v34 = vpop.permute.xlu0 %1097 }
 0x243   : > { %v1134_v0 = vsel %vm471_vm9, %v1133_v55, %v1098_v34  ;;  %v2725_v24 = vsel %vm467_vm7, %v2724_v25, %v2704_v19  ;;  %v3247_v19 = vld [vmem:[%s4905_s1 + $0x18] sm:$0xff] }
 0x244   : > { %3245 = vmatpush1.msk.msra.mxu1 %vm484_vm10, %v1134_v0 }
 0x245   : > { %3246 = vmatmul.mubr.msk.f32.vlgmr.msra.gmra.mrb[0].mxu1 %vm480_vm11, %v3243_v5  ;;  %v4956_v5 = vld [vmem:[#allocation21_spill] sm:$0xff] }
 0x246   : > { %v2676_v48 = vpop.permute.xlu1 %2675  ;;  %v2708_v41 = vpop.permute.xlu0 %2707  ;;  %1513 = vmatprep.mubr.f32.mxu1 %v4934_v46 }
 0x247   : > { %v2726_v21 = vsel %vm469_vm8, %v2725_v24, %v2708_v41  ;;  %v2718_v58 = vsel %vm467_vm7, %v2717_v63, %v2676_v48  ;;  %v3267_v63 = vld [vmem:[%s4905_s1 + $0x40] sm:$0xff] }
 0x24a   : > { %v1400_v29 = vpop.permute.xlu1 %1399  ;;  %v2680_v28 = vpop.permute.xlu0 %2679 }
 0x24b   : > { %v2719_v39 = vsel %vm469_vm8, %v2718_v58, %v2680_v28  ;;  %v1433_v59 = vsel %vm459_vm3, %v4954_v37, %v1400_v29  ;;  %v4957_v29 = vld [vmem:[#allocation24_spill] sm:$0xff] }
 0x24e   : > { %v2712_v17 = vpop.permute.xlu1 %2711  ;;  %v1372_v31 = vpop.permute.xlu0 %1371 }
 0x24f   : > { %v2727_v20 = vsel %vm471_vm9, %v2726_v21, %v2712_v17  ;;  %v1426_v4 = vsel %vm459_vm3, %v4955_v26, %v1372_v31 }
 0x250   : > { %3264 = vmatprep.subr.msk.mxu0 %vm484_vm10, %v2727_v20 }
 0x252   : > { %v1404_v61 = vpop.permute.xlu1 %1403  ;;  %v2684_v54 = vpop.permute.xlu0 %2683 }
 0x253   : > { %v2720_v27 = vsel %vm471_vm9, %v2719_v39, %v2684_v54  ;;  %v1434_v13 = vsel %vm461_vm4, %v1433_v59, %v1404_v61 }
 0x254   : > { %3265 = vmatpush1.msk.msra.mxu0 %vm484_vm10, %v2720_v27 }
 0x255   : > { %3266 = vmatmul.mubr.msk.f32.vlgmr.msra.gmra.mrb[0].mxu0 %vm480_vm11, %v3263_v22 }
 0x256   : > { %v1376_v30 = vpop.permute.xlu1 %1375  ;;  %v1408_v57 = vpop.permute.xlu0 %1407  ;;  %3131 = vmatprep.mubr.f32.mxu0 %v4934_v46 }
 0x257   : > { %v1435_v46 = vsel %vm463_vm5, %v1434_v13, %v1408_v57  ;;  %v1427_v18 = vsel %vm461_vm4, %v1426_v4, %v1376_v30 }
 0x25a   : > { %v3018_v60 = vpop.permute.xlu1 %3017  ;;  %v1380_v15 = vpop.permute.xlu0 %1379 }
 0x25b   : > { %v1428_v40 = vsel %vm463_vm5, %v1427_v18, %v1380_v15  ;;  %v3051_v0 = vsel %vm459_vm3, %v4956_v5, %v3018_v60 }
 0x25e   : > { %v1412_v52 = vpop.permute.xlu1 %1411  ;;  %v2990_v32 = vpop.permute.xlu0 %2989 }
 0x25f   : > { %v1436_v12 = vsel %vm465_vm6, %v1435_v46, %v1412_v52  ;;  %v3044_v28 = vsel %vm459_vm3, %v4957_v29, %v2990_v32 }
 0x262   : > { %v3022_v50 = vpop.permute.xlu1 %3021  ;;  %v1384_v14 = vpop.permute.xlu0 %1383 }
 0x263   : > { %v1429_v38 = vsel %vm465_vm6, %v1428_v40, %v1384_v14  ;;  %v3052_v48 = vsel %vm461_vm4, %v3051_v0, %v3022_v50 }
 0x266   : > { %v1416_v42 = vpop.permute.xlu1 %1415  ;;  %v2994_v11 = vpop.permute.xlu0 %2993 }
 0x267   : > { %v1437_v3 = vsel %vm467_vm7, %v1436_v12, %v1416_v42  ;;  %v3045_v25 = vsel %vm461_vm4, %v3044_v28, %v2994_v11 }
 0x26a   : > { %v3026_v51 = vpop.permute.xlu1 %3025  ;;  %v1388_v53 = vpop.permute.xlu0 %1387 }
 0x26b   : > { %v1430_v9 = vsel %vm467_vm7, %v1429_v38, %v1388_v53  ;;  %v3053_v35 = vsel %vm463_vm5, %v3052_v48, %v3026_v51 }
 0x26e   : > { %v1420_v7 = vpop.permute.xlu1 %1419  ;;  %v2998_v1 = vpop.permute.xlu0 %2997 }
 0x26f   : > { %v1438_v62 = vsel %vm469_vm8, %v1437_v3, %v1420_v7  ;;  %v3046_v10 = vsel %vm463_vm5, %v3045_v25, %v2998_v1 }
 0x272   : > { %v3030_v56 = vpop.permute.xlu1 %3029  ;;  %v1392_v16 = vpop.permute.xlu0 %1391 }
 0x273   : > { %v1431_v45 = vsel %vm469_vm8, %v1430_v9, %v1392_v16  ;;  %v3054_v33 = vsel %vm465_vm6, %v3053_v35, %v3030_v56 }
 0x276   : > { %v1424_v23 = vpop.permute.xlu1 %1423  ;;  %v3002_v47 = vpop.permute.xlu0 %3001 }
 0x277   : > { %v1439_v8 = vsel %vm471_vm9, %v1438_v62, %v1424_v23  ;;  %v3047_v17 = vsel %vm465_vm6, %v3046_v10, %v3002_v47 }
 0x278   : > { %3248 = vmatprep.subr.msk.mxu1 %vm484_vm10, %v1439_v8 }
 0x27a   : > { %v3034_v43 = vpop.permute.xlu1 %3033  ;;  %v1396_v55 = vpop.permute.xlu0 %1395 }
 0x27b   : > { %v1432_v34 = vsel %vm471_vm9, %v1431_v45, %v1396_v55  ;;  %v3055_v49 = vsel %vm467_vm7, %v3054_v33, %v3034_v43 }
 0x27c   : > { %3249 = vmatpush1.msk.msra.mxu1 %vm484_vm10, %v1432_v34 }
 0x27d   : > { %3250 = vmatmul.mubr.msk.f32.vlgmr.msra.gmra.mrb[0].mxu1 %vm480_vm11, %v3247_v19 }
 0x27e   : > { %v3006_v41 = vpop.permute.xlu1 %3005  ;;  %v3038_v6 = vpop.permute.xlu0 %3037 }
 0x27f   : > { %v3056_v2 = vsel %vm469_vm8, %v3055_v49, %v3038_v6  ;;  %v3048_v31 = vsel %vm467_vm7, %v3047_v17, %v3006_v41 }
 0x282   : > { %v3010_v36 = vpop.permute.xlu1 %3009  ;;  %v3042_v24 = vpop.permute.xlu0 %3041 }
 0x283   : > { %v3057_v21 = vsel %vm471_vm9, %v3056_v2, %v3042_v24  ;;  %v3049_v44 = vsel %vm469_vm8, %v3048_v31, %v3010_v36 }
 0x284   : > { %3268 = vmatprep.subr.msk.mxu0 %vm484_vm10, %v3057_v21 }
 0x286   : > { %v3014_v20 = vpop.permute.xlu1 %3013 }
 0x287   : > { %v3050_v58 = vsel %vm471_vm9, %v3049_v44, %v3014_v20 }
 0x288   : > { %3269 = vmatpush1.msk.msra.mxu0 %vm484_vm10, %v3050_v58 }
 0x289   : > { %3270 = vmatmul.mubr.msk.f32.vlgmr.msra.gmra.mrb[0].mxu0 %vm480_vm11, %v3267_v63 }
 0x294   : > { %v256_v54 = vpop.permute.xlu0 %255 }
 0x350   : > { %v1515_v39 = vpop.f32.mrb[0].mxu1 }
 0x351   : > { %v1517_v61 = vpop.f32.mrb[1].mxu1  ;;  %v3278_v22 = vadd.f32 %v1515_v39, %v256_v54 }
 0x352   : > { %v3280_v27 = vadd.f32 %v1517_v61, %v256_v54 }
 0x35c   : > { %v3133_v30 = vpop.f32.mrb[0].mxu0 }
 0x35d   : > { %v3279_v57 = vadd.f32 %v3278_v22, %v3133_v30  ;;  %v3135_v60 = vpop.f32.mrb[1].mxu0 }
 0x35e   : > { %v3281_v15 = vadd.f32 %v3280_v27, %v3135_v60 }
 0x35f   : > { %3140 = vst [vmem:[%s188_s10] sm:$0xff] %v3279_v57 }
 0x360   : > { %3141 = vst [vmem:[%s188_s10 + $0x8] sm:$0xff] %v3281_v15 }
 0x361   : > { %3430 = shalt.err (!%p3427_p2)
}
 0x362   : > { %s3431_s5 = scalar_lea.hbm %s4860_s6, 256  ;;  %s3435_s26 = scalar_lea.hbm %s4907_s3, 512 }
 0x363   : > { %p3432_p4 = scmp.ne.s32.totalorder %s4860_s6, %s3431_s5  ;;  %p3436_p9 = scmp.lt.u32.totalorder %s4860_s6, %s4907_s3 }
 0x364   : > { %p3437_p1 = scmp.lt.u32.totalorder %s3435_s26, %s3431_s5  ;;  %p3439_p6 = scmp.lt.u32.totalorder %s3431_s5, %s4860_s6 }
 0x365   : > { %p3433_p5 = pnand %p3432_p4, %p4958_p11 }
 0x366   : > { %p3438_p3 = por %p3437_p1, %p3436_p9 }
 0x367   : > { %p3434_p7 = pneg %p3433_p5 }
 0x368   : > { %p3440_p12 = por %p3439_p6, %p3438_p3 }
 0x36a   : > { %p3441_p13 = pnand %p3440_p12, %p3434_p7 }
 0x36c   : > { %3444 = shalt.err (!%p3441_p13)
}
 0x36d   : > { %3298 = dma.vmem_to_hbm [thread:$0]  (%p4958_p11), %s4862_s11, 256, %s4860_s6, %s3143_s16  }
 0x36e PF: > { %s3169_s29 = sand.u32 1, %s3471_s12   ;;  %p4959_p8 = scmp.ne.s32.totalorder %s4923_s25, 0 }
 0x36f   : > { %p4960_p10 = scmp.ge.s32.totalorder %s3483_s15, 2  ;;  %s3170_s30 = scalar_lea.sflag [#allocation5], %s3169_s29 }
 0x371   : > { %p3305_p0 = pnand %p4960_p10, %p4959_p8 }
 0x373   : > { %3466 = dma.done.wait (!%p3305_p0), %s3170_s30, 256  }
 0x374   : > { %3468 = vsyncadd (!%p3305_p0), %s3170_s30, 4294967040  ;;  %p16_p2 = scmp.ge.s32.totalorder %s3548_s18, 4   ;;  %s4961_s12 = smov %s3475_s13 }
 0x375   : > { %s4962_s13 = smov %s3479_s14  ;;  %s4963_s14 = smov %s3560_s21 }
 0x376   : > { %s4964_s15 = smov %s3548_s18  ;;  %18 = sbr.rel (!%p16_p2) target bundleno = 5 (0x5), region = 85 }
 0x37d   :  { %3175 = vsyncpa [#allocation4], 1 }
 0x37e   :  { %3177 = vsyncpa [#allocation4 + $0x1], 1 }
 0x37f   :  { %3178 = vsyncpa [#allocation5], 1 }
 0x380   :  { %3180 = vsyncpa [#allocation5 + $0x1], 1 }

</bundles_post_ra>
